<compile_context>
chip_gen: v6e
topology: v6e:2x2x1
jax: 0.10.0
libtpu: 0.0.40
codegen_flags: <defaults>
</compile_context>

<pallas_src>
import functools
import math

import numpy as np
import jax
import jax.numpy as jnp
from jax.experimental import pallas as pl
from jax.experimental.pallas import tpu as pltpu

# ---------------- config (stand-in for config.ini) ----------------
EMB_DIM = 16     # [embedding] dim
HID_IN = 8       # [model-in] hidden_dim
ENC_DIM = 16     # [model-in] encode_dim
HID_OUT = 8      # [model-out] hidden_dim
BN_EPS = 1e-5


def _vmem():
    # whole-array block resident in VMEM (shapes are tiny, no grid)
    return pl.BlockSpec(memory_space=pltpu.MemorySpace.VMEM)


# ============================ in-kernel building blocks ============================

def _gat_block(out_ref, x, xt, adj, w_aug, w_asrc_t, bss, *, heads, f, input_relu):
    """GATConv(heads, concat=True, add_self_loops=True) -> +bias -> tanh -> folded BatchNorm(eval).

    w_aug  = [W | W@att_dst^T]           -> one projection matmul gives x@W and the dst terms
    w_asrc_t [heads, Din]                -> src terms as a row: w_asrc_t @ x^T  (one tiny matmul)
    bss    = [bias; bn_scale; bn_shift]  -> packed per-channel epilogue constants
    Per-head results are written straight into out_ref column slices (no concatenate).
    Returns the full [N, heads*f] activation read back from out_ref.
    """
    if input_relu:
        x = jnp.maximum(x, 0.0)
        xt = jnp.maximum(xt, 0.0)
    n = adj.shape[0]
    c = heads * f
    xp = jnp.dot(x, w_aug, preferred_element_type=jnp.float32)           # [N, c + heads]
    a_src = jnp.dot(w_asrc_t, xt, preferred_element_type=jnp.float32)    # [heads, N]

    row = jax.lax.broadcasted_iota(jnp.int32, (n, n), 0)
    col = jax.lax.broadcasted_iota(jnp.int32, (n, n), 1)
    mask = jnp.logical_or(adj > 0.0, row == col)                         # add_self_loops=True

    bias, scale, shift = bss[0:1, :], bss[1:2, :], bss[2:3, :]
    for h in range(heads):
        sl = slice(h * f, (h + 1) * f)
        e = xp[:, c + h:c + h + 1] + a_src[h:h + 1, :]                   # e[i,j] = a_dst_i + a_src_j
        e = jnp.where(e > 0, e, 0.2 * e)                                 # LeakyReLU(0.2)
        e = jnp.where(mask, e, jnp.float32(-1e30))                       # mask non-edges
        e = e - jnp.max(e, axis=1, keepdims=True)                        # stable softmax over sources
        num = jnp.exp(e)                                                 # masked entries underflow to 0
        alpha = num * pl.reciprocal(jnp.sum(num, axis=1, keepdims=True), approx=True)
        oh = jnp.dot(alpha, xp[:, sl], preferred_element_type=jnp.float32)   # [N, f]
        out_ref[:, sl] = jnp.tanh(oh + bias[:, sl]) * scale[:, sl] + shift[:, sl]
    return out_ref[...]


def _mlp2(h, m1, m2):
    """packed Linear -> ReLU -> Linear ; m = [W; b] with bias in the last row."""
    h = jnp.maximum(jnp.dot(h, m1[:-1, :], preferred_element_type=jnp.float32) + m1[-1:, :], 0.0)
    return jnp.dot(h, m2[:-1, :], preferred_element_type=jnp.float32) + m2[-1:, :]


# ============================ Pallas kernels ============================

def _gat_score_kernel(x_ref, xt_ref, adj_ref, w_ref, wsrc_ref, bss_ref, p_ref,
                      h_ref, s_ref, *, heads, f, input_relu):
    """encoder layer: GAT+tanh+BN fused with TopKPooling score (tanh(x.p/||p||)) and x*score gate."""
    h = _gat_block(h_ref, x_ref[...], xt_ref[...], adj_ref[...], w_ref[...],
                   wsrc_ref[...], bss_ref[...], heads=heads, f=f, input_relu=input_relu)
    p = p_ref[...]                                                       # [c, 1]
    score = jnp.tanh(jnp.dot(h, p, preferred_element_type=jnp.float32)
                     * jax.lax.rsqrt(jnp.sum(p * p)))                    # [N, 1]
    s_ref[...] = score
    h_ref[...] = h * score                                               # gate all nodes; glue gathers top-k


def _gat_kernel(x_ref, xt_ref, adj_ref, w_ref, wsrc_ref, bss_ref, h_ref, *, heads, f):
    """classifier conv_0: GAT+tanh+BN only."""
    _gat_block(h_ref, x_ref[...], xt_ref[...], adj_ref[...], w_ref[...],
               wsrc_ref[...], bss_ref[...], heads=heads, f=f, input_relu=False)


def _gat_mlp_sigmoid_kernel(x_ref, xt_ref, adj_ref, w_ref, wsrc_ref, bss_ref,
                            m1_ref, m2_ref, o_ref, h_scr, *, f):
    """classifier conv_1 + Linear->ReLU->Linear->sigmoid, intermediate kept in VMEM scratch."""
    h = _gat_block(h_scr, x_ref[...], xt_ref[...], adj_ref[...], w_ref[...],
                   wsrc_ref[...], bss_ref[...], heads=1, f=f, input_relu=False)
    y = _mlp2(h, m1_ref[...], m2_ref[...])
    o_ref[...] = 1.0 / (1.0 + jnp.exp(-y))                               # sigmoid (EUP exp)


def _pool_mlp_kernel(h_ref, m1_ref, m2_ref, o_ref, *, n_graphs, k):
    """global_max_pool over contiguous equal-size per-graph blocks + relu + encoder MLP."""
    h_all = h_ref[...]                                                   # [G*k, D]
    rows = [jnp.max(h_all[g * k:(g + 1) * k, :], axis=0, keepdims=True) for g in range(n_graphs)]
    h = jnp.maximum(jnp.concatenate(rows, axis=0), 0.0)                  # [G, D], .relu()
    o_ref[...] = _mlp2(h, m1_ref[...], m2_ref[...])


# ============================ wrappers ============================

def gat_score_layer(x, adj, p, heads, f, input_relu=False):
    n = x.shape[0]
    c = heads * f
    args = (x, jnp.transpose(x), adj, p["w_aug"], p["w_asrc_t"], p["bss"], p["p_pool"])
    return pl.pallas_call(
        functools.partial(_gat_score_kernel, heads=heads, f=f, input_relu=input_relu),
        out_shape=(jax.ShapeDtypeStruct((n, c), jnp.float32),
                   jax.ShapeDtypeStruct((n, 1), jnp.float32)),
        in_specs=[_vmem() for _ in args],
        out_specs=(_vmem(), _vmem()),
    )(*args)


def gat_layer(x, adj, p, heads, f):
    n = x.shape[0]
    c = heads * f
    args = (x, jnp.transpose(x), adj, p["w_aug"], p["w_asrc_t"], p["bss"])
    return pl.pallas_call(
        functools.partial(_gat_kernel, heads=heads, f=f),
        out_shape=jax.ShapeDtypeStruct((n, c), jnp.float32),
        in_specs=[_vmem() for _ in args],
        out_specs=_vmem(),
    )(*args)


def gat_mlp_sigmoid(x, adj, p, m1, m2, f):
    n = x.shape[0]
    args = (x, jnp.transpose(x), adj, p["w_aug"], p["w_asrc_t"], p["bss"], m1, m2)
    return pl.pallas_call(
        functools.partial(_gat_mlp_sigmoid_kernel, f=f),
        out_shape=jax.ShapeDtypeStruct((n, 1), jnp.float32),
        in_specs=[_vmem() for _ in args],
        out_specs=_vmem(),
        scratch_shapes=[pltpu.VMEM((n, f), jnp.float32)],
    )(*args)


def pool_mlp(h, m1, m2, n_graphs, k):
    d_out = m2.shape[1]
    return pl.pallas_call(
        functools.partial(_pool_mlp_kernel, n_graphs=n_graphs, k=k),
        out_shape=jax.ShapeDtypeStruct((n_graphs, d_out), jnp.float32),
        in_specs=[_vmem(), _vmem(), _vmem()],
        out_specs=_vmem(),
    )(h, m1, m2)


def topk_select(h_gated, score, adj, n_graphs, n_per, ratio):
    """TopKPooling tail: per-graph top-k selection + edge filtering.
    TODO(synk): data-dependent gathers (top_k / filter_adj) stay in plain-JAX glue.
    Note: score nonlinearity + x*score gating already happened inside the GAT kernel,
    and the resulting node order stays contiguous & equal-size per graph (pool_mlp relies on it)."""
    k = int(math.ceil(ratio * n_per))
    _, top_idx = jax.lax.top_k(score.reshape(n_graphs, n_per), k)                    # [G, k]
    perm = (top_idx + jnp.arange(n_graphs, dtype=top_idx.dtype)[:, None] * n_per).reshape(-1)
    h_new = jnp.take(h_gated, perm, axis=0)
    adj_new = None if adj is None else jnp.take(jnp.take(adj, perm, axis=0), perm, axis=1)
    return h_new, adj_new, k


# ============================ model forward ============================

def statement_encoder(x, adj, params, n_graphs, n_per):
    # layer_0 (GAT heads=3 -> tanh -> BN) fused with pooling_0's score + gate
    h, s = gat_score_layer(x, adj, params["enc_layer0"], heads=3, f=HID_IN)
    h, adj, n_per = topk_select(h, s, adj, n_graphs, n_per, 0.7)
    # the h.relu() after pooling_0 is fused as input_relu of layer_1 (+ pooling_1 score/gate)
    h, s = gat_score_layer(h, adj, params["enc_layer1"], heads=1, f=HID_IN, input_relu=True)
    h, _, n_per = topk_select(h, s, None, n_graphs, n_per, 0.5)
    # global_max_pool(batch) + relu + mlp (Linear -> ReLU -> Linear), all in one kernel
    return pool_mlp(h, params["enc_mlp1"], params["enc_mlp2"], n_graphs, n_per)


@functools.partial(jax.jit, static_argnames=("n_graphs", "n_per"))
def forward_probs(ast_x, ast_adj, stmt_adj, params, n_graphs, n_per):
    statements_vec = statement_encoder(ast_x, ast_adj, params, n_graphs, n_per)      # [S, ENC_DIM]
    h = gat_layer(statements_vec, stmt_adj, params["conv0"], heads=3, f=HID_OUT)     # [S, 3*HID_OUT]
    m1, m2 = params["out_mlp"]
    return gat_mlp_sigmoid(h, stmt_adj, params["conv1"], m1, m2, f=HID_OUT)          # [S, 1]


def statement_classifier_single_edge(ast_x, ast_adj, stmt_adj, idx_np, params, n_graphs, n_per):
    probs = forward_probs(ast_x, ast_adj, stmt_adj, params, n_graphs=n_graphs, n_per=n_per)
    # idx2index + index_select: idx is host-side (numpy) -> static selection, no device<->host sync
    sel = np.nonzero(np.asarray(idx_np) == 1)[0]
    return jnp.take(probs, jnp.asarray(sel, dtype=jnp.int32), axis=0)


# ============================ deterministic init ============================

def _uniform(key, shape, bound):
    return jax.random.uniform(key, shape, jnp.float32, -bound, bound)


def init_gat_params(key, d_in, heads, f):
    c = heads * f
    k = jax.random.split(key, 3)
    w = _uniform(k[0], (d_in, c), math.sqrt(6.0 / (d_in + c)))            # glorot
    asrc = _uniform(k[1], (heads, f), math.sqrt(6.0 / (1 + f)))
    adst = _uniform(k[2], (heads, f), math.sqrt(6.0 / (1 + f)))
    wh = w.reshape(d_in, heads, f)
    w_adst = jnp.einsum("dhf,hf->dh", wh, adst)                           # a_dst_i = x_i @ w_adst[:, h]
    w_asrc_t = jnp.einsum("dhf,hf->hd", wh, asrc)                         # a_src row = w_asrc_t @ x^T
    w_aug = jnp.concatenate([w, w_adst], axis=1)                          # [d_in, c + heads]
    # BatchNorm(eval) folded into scale/shift; bias/scale/shift packed into one array
    bias = jnp.zeros((c,), jnp.float32)
    gamma = jnp.ones((c,), jnp.float32)
    beta = jnp.zeros((c,), jnp.float32)
    mean = jnp.zeros((c,), jnp.float32)
    var = jnp.ones((c,), jnp.float32)
    scale = gamma * jax.lax.rsqrt(var + BN_EPS)
    shift = beta - mean * scale
    bss = jnp.stack([bias, scale, shift], axis=0)                         # [3, c]
    return dict(w_aug=w_aug, w_asrc_t=w_asrc_t, bss=bss)


def init_linear_packed(key, d_in, d_out):
    k1, k2 = jax.random.split(key)
    w = _uniform(k1, (d_in, d_out), math.sqrt(6.0 / d_in))                # kaiming_uniform-style
    b = _uniform(k2, (1, d_out), 1.0 / math.sqrt(d_in))
    return jnp.concatenate([w, b], axis=0)                                # [d_in + 1, d_out]


def init_params(key):
    ks = jax.random.split(key, 10)
    enc0 = init_gat_params(ks[0], EMB_DIM, 3, HID_IN)
    enc0["p_pool"] = _uniform(ks[1], (3 * HID_IN, 1), math.sqrt(1.0 / (3 * HID_IN)))
    enc1 = init_gat_params(ks[2], 3 * HID_IN, 1, HID_IN)
    enc1["p_pool"] = _uniform(ks[3], (HID_IN, 1), math.sqrt(1.0 / HID_IN))
    return {
        "enc_layer0": enc0,
        "enc_layer1": enc1,
        "enc_mlp1": init_linear_packed(ks[4], HID_IN, HID_IN),
        "enc_mlp2": init_linear_packed(ks[5], HID_IN, ENC_DIM),
        "conv0": init_gat_params(ks[6], ENC_DIM, 3, HID_OUT),
        "conv1": init_gat_params(ks[7], 3 * HID_OUT, 1, HID_OUT),
        "out_mlp": (init_linear_packed(ks[8], HID_OUT, HID_OUT),
                    init_linear_packed(ks[9], HID_OUT, 1)),
    }


# ============================ example run ============================

if __name__ == "__main__":
    key = jax.random.PRNGKey(0)
    k_param, k_ast = jax.random.split(key)
    params = init_params(k_param)

    # astss batch: S statement-AST graphs, Na nodes each (flattened PyG-style batch)
    S, Na = 4, 6
    Nt = S * Na
    ast_x = jax.random.normal(k_ast, (Nt, EMB_DIM), jnp.float32)

    ast_adj = np.zeros((Nt, Nt), np.float32)          # adj[dst, src]
    for g in range(S):
        base = g * Na
        for i in range(Na - 1):
            ast_adj[base + i + 1, base + i] = 1.0     # i -> i+1
            ast_adj[base + i, base + i + 1] = 1.0     # i+1 -> i
    ast_adj = jnp.asarray(ast_adj)

    # outer statement graph (data.edge_index) over S statement nodes
    stmt_edges = [(0, 1), (1, 0), (1, 2), (2, 1), (2, 3), (3, 2), (0, 3), (3, 0)]
    stmt_adj_np = np.zeros((S, S), np.float32)
    for src, dst in stmt_edges:
        stmt_adj_np[dst, src] = 1.0
    stmt_adj = jnp.asarray(stmt_adj_np)

    idx = np.array([1, 0, 1, 1], np.int32)            # data.idx sparse selector

    out = statement_classifier_single_edge(ast_x, ast_adj, stmt_adj, idx, params, S, Na)
    out = jax.block_until_ready(out)
    assert out.shape == (int(idx.sum()), 1)
    assert bool(jnp.all((out > 0.0) & (out < 1.0)))
    print("KERNEL_OK")
</pallas_src>

<mosaic_0001>
module attributes {stable_mosaic.version = 11 : i64} {
  func.func @_gat_score_kernel(%arg0: memref<24x16xf32, #tpu.memory_space<vmem>>, %arg1: memref<16x24xf32, #tpu.memory_space<vmem>>, %arg2: memref<24x24xf32, #tpu.memory_space<vmem>>, %arg3: memref<16x27xf32, #tpu.memory_space<vmem>>, %arg4: memref<3x16xf32, #tpu.memory_space<vmem>>, %arg5: memref<3x24xf32, #tpu.memory_space<vmem>>, %arg6: memref<24x1xf32, #tpu.memory_space<vmem>>, %arg7: memref<24x24xf32, #tpu.memory_space<vmem>>, %arg8: memref<24x1xf32, #tpu.memory_space<vmem>>) attributes {dimension_semantics = [], scalar_prefetch = 0 : i64, scratch_operands = 0 : i64, tpu.core_type = #tpu.core_type<tc>} {
    %c0 = arith.constant 0 : index
    %c0_0 = arith.constant 0 : index
    %0 = vector.load %arg0[%c0, %c0_0] : memref<24x16xf32, #tpu.memory_space<vmem>>, vector<24x16xf32>
    %c0_1 = arith.constant 0 : index
    %c0_2 = arith.constant 0 : index
    %1 = vector.load %arg1[%c0_1, %c0_2] : memref<16x24xf32, #tpu.memory_space<vmem>>, vector<16x24xf32>
    %c0_3 = arith.constant 0 : index
    %c0_4 = arith.constant 0 : index
    %2 = vector.load %arg2[%c0_3, %c0_4] : memref<24x24xf32, #tpu.memory_space<vmem>>, vector<24x24xf32>
    %c0_5 = arith.constant 0 : index
    %c0_6 = arith.constant 0 : index
    %3 = vector.load %arg3[%c0_5, %c0_6] : memref<16x27xf32, #tpu.memory_space<vmem>>, vector<16x27xf32>
    %c0_7 = arith.constant 0 : index
    %c0_8 = arith.constant 0 : index
    %4 = vector.load %arg4[%c0_7, %c0_8] : memref<3x16xf32, #tpu.memory_space<vmem>>, vector<3x16xf32>
    %c0_9 = arith.constant 0 : index
    %c0_10 = arith.constant 0 : index
    %5 = vector.load %arg5[%c0_9, %c0_10] : memref<3x24xf32, #tpu.memory_space<vmem>>, vector<3x24xf32>
    %cst = arith.constant dense<0.000000e+00> : vector<24x27xf32>
    %6 = tpu.matmul %0, %3, %cst {dimension_numbers = #tpu.dot_dimension_numbers<[1], [0], [0], [1], [0, 0, 1, 1], [], []>} : vector<24x16xf32>, vector<16x27xf32>, vector<24x27xf32> -> vector<24x27xf32>
    %cst_11 = arith.constant dense<0.000000e+00> : vector<3x24xf32>
    %7 = tpu.matmul %4, %1, %cst_11 {dimension_numbers = #tpu.dot_dimension_numbers<[1], [0], [0], [1], [0, 0, 1, 1], [], []>} : vector<3x16xf32>, vector<16x24xf32>, vector<3x24xf32> -> vector<3x24xf32>
    %8 = tpu.iota {dimensions = array<i32: 0>} : vector<24x24xi32>
    %9 = tpu.iota {dimensions = array<i32: 1>} : vector<24x24xi32>
    %cst_12 = arith.constant 0.000000e+00 : f32
    %10 = vector.broadcast %cst_12 : f32 to vector<24x24xf32>
    %11 = arith.cmpf ogt, %2, %10 : vector<24x24xf32>
    %12 = arith.cmpi eq, %8, %9 : vector<24x24xi32>
    %13 = arith.ori %11, %12 : vector<24x24xi1>
    %14 = vector.extract_strided_slice %5 {offsets = [0, 0], sizes = [1, 24], strides = [1, 1]} : vector<3x24xf32> to vector<1x24xf32>
    %15 = vector.extract_strided_slice %5 {offsets = [1, 0], sizes = [1, 24], strides = [1, 1]} : vector<3x24xf32> to vector<1x24xf32>
    %16 = vector.extract_strided_slice %5 {offsets = [2, 0], sizes = [1, 24], strides = [1, 1]} : vector<3x24xf32> to vector<1x24xf32>
    %17 = vector.extract_strided_slice %6 {offsets = [0, 24], sizes = [24, 1], strides = [1, 1]} : vector<24x27xf32> to vector<24x1xf32>
    %18 = vector.extract_strided_slice %7 {offsets = [0, 0], sizes = [1, 24], strides = [1, 1]} : vector<3x24xf32> to vector<1x24xf32>
    %19 = vector.broadcast %17 : vector<24x1xf32> to vector<24x24xf32>
    %20 = vector.broadcast %18 : vector<1x24xf32> to vector<24x24xf32>
    %21 = arith.addf %19, %20 : vector<24x24xf32>
    %cst_13 = arith.constant 0.000000e+00 : f32
    %22 = vector.broadcast %cst_13 : f32 to vector<24x24xf32>
    %23 = arith.cmpf ogt, %21, %22 : vector<24x24xf32>
    %cst_14 = arith.constant 2.000000e-01 : f32
    %24 = vector.broadcast %cst_14 : f32 to vector<24x24xf32>
    %25 = arith.mulf %24, %21 : vector<24x24xf32>
    %26 = arith.select %23, %21, %25 : vector<24x24xi1>, vector<24x24xf32>
    %cst_15 = arith.constant -1.000000e+30 : f32
    %27 = vector.broadcast %cst_15 : f32 to vector<24x24xf32>
    %28 = arith.select %13, %26, %27 : vector<24x24xi1>, vector<24x24xf32>
    %cst_16 = arith.constant dense<0xFF800000> : vector<24xf32>
    %29 = vector.multi_reduction <maximumf>, %28, %cst_16 [1] : vector<24x24xf32> to vector<24xf32>
    %30 = vector.shape_cast %29 : vector<24xf32> to vector<24x1xf32>
    %31 = vector.broadcast %30 : vector<24x1xf32> to vector<24x24xf32>
    %32 = arith.subf %28, %31 : vector<24x24xf32>
    %33 = math.exp %32 : vector<24x24xf32>
    %cst_17 = arith.constant dense<0.000000e+00> : vector<24xf32>
    %34 = vector.multi_reduction <add>, %33, %cst_17 [1] : vector<24x24xf32> to vector<24xf32>
    %35 = vector.shape_cast %34 : vector<24xf32> to vector<24x1xf32>
    %36 = tpu.reciprocal %35 {approx = true} : vector<24x1xf32> -> vector<24x1xf32>
    %37 = vector.broadcast %36 : vector<24x1xf32> to vector<24x24xf32>
    %38 = arith.mulf %33, %37 : vector<24x24xf32>
    %39 = vector.extract_strided_slice %6 {offsets = [0, 0], sizes = [24, 8], strides = [1, 1]} : vector<24x27xf32> to vector<24x8xf32>
    %cst_18 = arith.constant dense<0.000000e+00> : vector<24x8xf32>
    %40 = tpu.matmul %38, %39, %cst_18 {dimension_numbers = #tpu.dot_dimension_numbers<[1], [0], [0], [1], [0, 0, 1, 1], [], []>} : vector<24x24xf32>, vector<24x8xf32>, vector<24x8xf32> -> vector<24x8xf32>
    %41 = vector.extract_strided_slice %14 {offsets = [0, 0], sizes = [1, 8], strides = [1, 1]} : vector<1x24xf32> to vector<1x8xf32>
    %42 = vector.broadcast %41 : vector<1x8xf32> to vector<24x8xf32>
    %43 = arith.addf %40, %42 : vector<24x8xf32>
    %44 = math.tanh %43 : vector<24x8xf32>
    %45 = vector.extract_strided_slice %15 {offsets = [0, 0], sizes = [1, 8], strides = [1, 1]} : vector<1x24xf32> to vector<1x8xf32>
    %46 = vector.broadcast %45 : vector<1x8xf32> to vector<24x8xf32>
    %47 = arith.mulf %44, %46 : vector<24x8xf32>
    %48 = vector.extract_strided_slice %16 {offsets = [0, 0], sizes = [1, 8], strides = [1, 1]} : vector<1x24xf32> to vector<1x8xf32>
    %49 = vector.broadcast %48 : vector<1x8xf32> to vector<24x8xf32>
    %50 = arith.addf %47, %49 : vector<24x8xf32>
    %c0_19 = arith.constant 0 : index
    %c0_20 = arith.constant 0 : index
    %51 = vector.load %arg7[%c0_19, %c0_20] : memref<24x24xf32, #tpu.memory_space<vmem>>, vector<24x8xf32>
    tpu.vector_store %arg7[%c0_19, %c0_20], %50 {strides = array<i32>} : memref<24x24xf32, #tpu.memory_space<vmem>>, vector<24x8xf32>,
    %52 = vector.extract_strided_slice %6 {offsets = [0, 25], sizes = [24, 1], strides = [1, 1]} : vector<24x27xf32> to vector<24x1xf32>
    %53 = vector.extract_strided_slice %7 {offsets = [1, 0], sizes = [1, 24], strides = [1, 1]} : vector<3x24xf32> to vector<1x24xf32>
    %54 = vector.broadcast %52 : vector<24x1xf32> to vector<24x24xf32>
    %55 = vector.broadcast %53 : vector<1x24xf32> to vector<24x24xf32>
    %56 = arith.addf %54, %55 : vector<24x24xf32>
    %cst_21 = arith.constant 0.000000e+00 : f32
    %57 = vector.broadcast %cst_21 : f32 to vector<24x24xf32>
    %58 = arith.cmpf ogt, %56, %57 : vector<24x24xf32>
    %cst_22 = arith.constant 2.000000e-01 : f32
    %59 = vector.broadcast %cst_22 : f32 to vector<24x24xf32>
    %60 = arith.mulf %59, %56 : vector<24x24xf32>
    %61 = arith.select %58, %56, %60 : vector<24x24xi1>, vector<24x24xf32>
    %cst_23 = arith.constant -1.000000e+30 : f32
    %62 = vector.broadcast %cst_23 : f32 to vector<24x24xf32>
    %63 = arith.select %13, %61, %62 : vector<24x24xi1>, vector<24x24xf32>
    %cst_24 = arith.constant dense<0xFF800000> : vector<24xf32>
    %64 = vector.multi_reduction <maximumf>, %63, %cst_24 [1] : vector<24x24xf32> to vector<24xf32>
    %65 = vector.shape_cast %64 : vector<24xf32> to vector<24x1xf32>
    %66 = vector.broadcast %65 : vector<24x1xf32> to vector<24x24xf32>
    %67 = arith.subf %63, %66 : vector<24x24xf32>
    %68 = math.exp %67 : vector<24x24xf32>
    %cst_25 = arith.constant dense<0.000000e+00> : vector<24xf32>
    %69 = vector.multi_reduction <add>, %68, %cst_25 [1] : vector<24x24xf32> to vector<24xf32>
    %70 = vector.shape_cast %69 : vector<24xf32> to vector<24x1xf32>
    %71 = tpu.reciprocal %70 {approx = true} : vector<24x1xf32> -> vector<24x1xf32>
    %72 = vector.broadcast %71 : vector<24x1xf32> to vector<24x24xf32>
    %73 = arith.mulf %68, %72 : vector<24x24xf32>
    %74 = vector.extract_strided_slice %6 {offsets = [0, 8], sizes = [24, 8], strides = [1, 1]} : vector<24x27xf32> to vector<24x8xf32>
    %cst_26 = arith.constant dense<0.000000e+00> : vector<24x8xf32>
    %75 = tpu.matmul %73, %74, %cst_26 {dimension_numbers = #tpu.dot_dimension_numbers<[1], [0], [0], [1], [0, 0, 1, 1], [], []>} : vector<24x24xf32>, vector<24x8xf32>, vector<24x8xf32> -> vector<24x8xf32>
    %76 = vector.extract_strided_slice %14 {offsets = [0, 8], sizes = [1, 8], strides = [1, 1]} : vector<1x24xf32> to vector<1x8xf32>
    %77 = vector.broadcast %76 : vector<1x8xf32> to vector<24x8xf32>
    %78 = arith.addf %75, %77 : vector<24x8xf32>
    %79 = math.tanh %78 : vector<24x8xf32>
    %80 = vector.extract_strided_slice %15 {offsets = [0, 8], sizes = [1, 8], strides = [1, 1]} : vector<1x24xf32> to vector<1x8xf32>
    %81 = vector.broadcast %80 : vector<1x8xf32> to vector<24x8xf32>
    %82 = arith.mulf %79, %81 : vector<24x8xf32>
    %83 = vector.extract_strided_slice %16 {offsets = [0, 8], sizes = [1, 8], strides = [1, 1]} : vector<1x24xf32> to vector<1x8xf32>
    %84 = vector.broadcast %83 : vector<1x8xf32> to vector<24x8xf32>
    %85 = arith.addf %82, %84 : vector<24x8xf32>
    %c0_27 = arith.constant 0 : index
    %c8 = arith.constant 8 : index
    %86 = vector.load %arg7[%c0_27, %c8] : memref<24x24xf32, #tpu.memory_space<vmem>>, vector<24x8xf32>
    tpu.vector_store %arg7[%c0_27, %c8], %85 {strides = array<i32>} : memref<24x24xf32, #tpu.memory_space<vmem>>, vector<24x8xf32>,
    %87 = vector.extract_strided_slice %6 {offsets = [0, 26], sizes = [24, 1], strides = [1, 1]} : vector<24x27xf32> to vector<24x1xf32>
    %88 = vector.extract_strided_slice %7 {offsets = [2, 0], sizes = [1, 24], strides = [1, 1]} : vector<3x24xf32> to vector<1x24xf32>
    %89 = vector.broadcast %87 : vector<24x1xf32> to vector<24x24xf32>
    %90 = vector.broadcast %88 : vector<1x24xf32> to vector<24x24xf32>
    %91 = arith.addf %89, %90 : vector<24x24xf32>
    %cst_28 = arith.constant 0.000000e+00 : f32
    %92 = vector.broadcast %cst_28 : f32 to vector<24x24xf32>
    %93 = arith.cmpf ogt, %91, %92 : vector<24x24xf32>
    %cst_29 = arith.constant 2.000000e-01 : f32
    %94 = vector.broadcast %cst_29 : f32 to vector<24x24xf32>
    %95 = arith.mulf %94, %91 : vector<24x24xf32>
    %96 = arith.select %93, %91, %95 : vector<24x24xi1>, vector<24x24xf32>
    %cst_30 = arith.constant -1.000000e+30 : f32
    %97 = vector.broadcast %cst_30 : f32 to vector<24x24xf32>
    %98 = arith.select %13, %96, %97 : vector<24x24xi1>, vector<24x24xf32>
    %cst_31 = arith.constant dense<0xFF800000> : vector<24xf32>
    %99 = vector.multi_reduction <maximumf>, %98, %cst_31 [1] : vector<24x24xf32> to vector<24xf32>
    %100 = vector.shape_cast %99 : vector<24xf32> to vector<24x1xf32>
    %101 = vector.broadcast %100 : vector<24x1xf32> to vector<24x24xf32>
    %102 = arith.subf %98, %101 : vector<24x24xf32>
    %103 = math.exp %102 : vector<24x24xf32>
    %cst_32 = arith.constant dense<0.000000e+00> : vector<24xf32>
    %104 = vector.multi_reduction <add>, %103, %cst_32 [1] : vector<24x24xf32> to vector<24xf32>
    %105 = vector.shape_cast %104 : vector<24xf32> to vector<24x1xf32>
    %106 = tpu.reciprocal %105 {approx = true} : vector<24x1xf32> -> vector<24x1xf32>
    %107 = vector.broadcast %106 : vector<24x1xf32> to vector<24x24xf32>
    %108 = arith.mulf %103, %107 : vector<24x24xf32>
    %109 = vector.extract_strided_slice %6 {offsets = [0, 16], sizes = [24, 8], strides = [1, 1]} : vector<24x27xf32> to vector<24x8xf32>
    %cst_33 = arith.constant dense<0.000000e+00> : vector<24x8xf32>
    %110 = tpu.matmul %108, %109, %cst_33 {dimension_numbers = #tpu.dot_dimension_numbers<[1], [0], [0], [1], [0, 0, 1, 1], [], []>} : vector<24x24xf32>, vector<24x8xf32>, vector<24x8xf32> -> vector<24x8xf32>
    %111 = vector.extract_strided_slice %14 {offsets = [0, 16], sizes = [1, 8], strides = [1, 1]} : vector<1x24xf32> to vector<1x8xf32>
    %112 = vector.broadcast %111 : vector<1x8xf32> to vector<24x8xf32>
    %113 = arith.addf %110, %112 : vector<24x8xf32>
    %114 = math.tanh %113 : vector<24x8xf32>
    %115 = vector.extract_strided_slice %15 {offsets = [0, 16], sizes = [1, 8], strides = [1, 1]} : vector<1x24xf32> to vector<1x8xf32>
    %116 = vector.broadcast %115 : vector<1x8xf32> to vector<24x8xf32>
    %117 = arith.mulf %114, %116 : vector<24x8xf32>
    %118 = vector.extract_strided_slice %16 {offsets = [0, 16], sizes = [1, 8], strides = [1, 1]} : vector<1x24xf32> to vector<1x8xf32>
    %119 = vector.broadcast %118 : vector<1x8xf32> to vector<24x8xf32>
    %120 = arith.addf %117, %119 : vector<24x8xf32>
    %c0_34 = arith.constant 0 : index
    %c16 = arith.constant 16 : index
    %121 = vector.load %arg7[%c0_34, %c16] : memref<24x24xf32, #tpu.memory_space<vmem>>, vector<24x8xf32>
    tpu.vector_store %arg7[%c0_34, %c16], %120 {strides = array<i32>} : memref<24x24xf32, #tpu.memory_space<vmem>>, vector<24x8xf32>,
    %c0_35 = arith.constant 0 : index
    %c0_36 = arith.constant 0 : index
    %122 = vector.load %arg7[%c0_35, %c0_36] : memref<24x24xf32, #tpu.memory_space<vmem>>, vector<24x24xf32>
    %c0_37 = arith.constant 0 : index
    %c0_38 = arith.constant 0 : index
    %123 = vector.load %arg6[%c0_37, %c0_38] : memref<24x1xf32, #tpu.memory_space<vmem>>, vector<24x1xf32>
    %cst_39 = arith.constant dense<0.000000e+00> : vector<24x1xf32>
    %124 = tpu.matmul %122, %123, %cst_39 {dimension_numbers = #tpu.dot_dimension_numbers<[1], [0], [0], [1], [0, 0, 1, 1], [], []>} : vector<24x24xf32>, vector<24x1xf32>, vector<24x1xf32> -> vector<24x1xf32>
    %125 = arith.mulf %123, %123 : vector<24x1xf32>
    %126 = vector.shape_cast %125 : vector<24x1xf32> to vector<1x24x1xf32>
    %cst_40 = arith.constant dense<0.000000e+00> : vector<1xf32>
    %127 = vector.multi_reduction <add>, %126, %cst_40 [1, 2] : vector<1x24x1xf32> to vector<1xf32>
    %128 = vector.shape_cast %127 : vector<1xf32> to vector<1x1x1xf32>
    %129 = vector.extract %128[0, 0, 0] : f32 from vector<1x1x1xf32>
    %130 = math.rsqrt %129 : f32
    %131 = vector.broadcast %130 : f32 to vector<24x1xf32>
    %132 = arith.mulf %124, %131 : vector<24x1xf32>
    %133 = math.tanh %132 : vector<24x1xf32>
    %c0_41 = arith.constant 0 : index
    %c0_42 = arith.constant 0 : index
    %134 = vector.load %arg8[%c0_41, %c0_42] : memref<24x1xf32, #tpu.memory_space<vmem>>, vector<24x1xf32>
    tpu.vector_store %arg8[%c0_41, %c0_42], %133 {strides = array<i32>} : memref<24x1xf32, #tpu.memory_space<vmem>>, vector<24x1xf32>,
    %135 = vector.broadcast %133 : vector<24x1xf32> to vector<24x24xf32>
    %136 = arith.mulf %122, %135 : vector<24x24xf32>
    %c0_43 = arith.constant 0 : index
    %c0_44 = arith.constant 0 : index
    %137 = vector.load %arg7[%c0_43, %c0_44] : memref<24x24xf32, #tpu.memory_space<vmem>>, vector<24x24xf32>
    tpu.vector_store %arg7[%c0_43, %c0_44], %136 {strides = array<i32>} : memref<24x24xf32, #tpu.memory_space<vmem>>, vector<24x24xf32>,
    return
  }
}

module attributes {stable_mosaic.version = 11 : i64} {
  func.func @_gat_score_kernel(%arg0: memref<20x24xf32, #tpu.memory_space<vmem>>, %arg1: memref<24x20xf32, #tpu.memory_space<vmem>>, %arg2: memref<20x20xf32, #tpu.memory_space<vmem>>, %arg3: memref<24x9xf32, #tpu.memory_space<vmem>>, %arg4: memref<1x24xf32, #tpu.memory_space<vmem>>, %arg5: memref<3x8xf32, #tpu.memory_space<vmem>>, %arg6: memref<8x1xf32, #tpu.memory_space<vmem>>, %arg7: memref<20x8xf32, #tpu.memory_space<vmem>>, %arg8: memref<20x1xf32, #tpu.memory_space<vmem>>) attributes {dimension_semantics = [], scalar_prefetch = 0 : i64, scratch_operands = 0 : i64, tpu.core_type = #tpu.core_type<tc>} {
    %c0 = arith.constant 0 : index
    %c0_0 = arith.constant 0 : index
    %0 = vector.load %arg0[%c0, %c0_0] : memref<20x24xf32, #tpu.memory_space<vmem>>, vector<20x24xf32>
    %c0_1 = arith.constant 0 : index
    %c0_2 = arith.constant 0 : index
    %1 = vector.load %arg1[%c0_1, %c0_2] : memref<24x20xf32, #tpu.memory_space<vmem>>, vector<24x20xf32>
    %c0_3 = arith.constant 0 : index
    %c0_4 = arith.constant 0 : index
    %2 = vector.load %arg2[%c0_3, %c0_4] : memref<20x20xf32, #tpu.memory_space<vmem>>, vector<20x20xf32>
    %c0_5 = arith.constant 0 : index
    %c0_6 = arith.constant 0 : index
    %3 = vector.load %arg3[%c0_5, %c0_6] : memref<24x9xf32, #tpu.memory_space<vmem>>, vector<24x9xf32>
    %c0_7 = arith.constant 0 : index
    %c0_8 = arith.constant 0 : index
    %4 = vector.load %arg4[%c0_7, %c0_8] : memref<1x24xf32, #tpu.memory_space<vmem>>, vector<1x24xf32>
    %c0_9 = arith.constant 0 : index
    %c0_10 = arith.constant 0 : index
    %5 = vector.load %arg5[%c0_9, %c0_10] : memref<3x8xf32, #tpu.memory_space<vmem>>, vector<3x8xf32>
    %cst = arith.constant 0.000000e+00 : f32
    %6 = vector.broadcast %cst : f32 to vector<20x24xf32>
    %7 = arith.maximumf %0, %6 : vector<20x24xf32>
    %cst_11 = arith.constant 0.000000e+00 : f32
    %8 = vector.broadcast %cst_11 : f32 to vector<24x20xf32>
    %9 = arith.maximumf %1, %8 : vector<24x20xf32>
    %cst_12 = arith.constant dense<0.000000e+00> : vector<20x9xf32>
    %10 = tpu.matmul %7, %3, %cst_12 {dimension_numbers = #tpu.dot_dimension_numbers<[1], [0], [0], [1], [0, 0, 1, 1], [], []>} : vector<20x24xf32>, vector<24x9xf32>, vector<20x9xf32> -> vector<20x9xf32>
    %cst_13 = arith.constant dense<0.000000e+00> : vector<1x20xf32>
    %11 = tpu.matmul %4, %9, %cst_13 {dimension_numbers = #tpu.dot_dimension_numbers<[1], [0], [0], [1], [0, 0, 1, 1], [], []>} : vector<1x24xf32>, vector<24x20xf32>, vector<1x20xf32> -> vector<1x20xf32>
    %12 = tpu.iota {dimensions = array<i32: 0>} : vector<20x20xi32>
    %13 = tpu.iota {dimensions = array<i32: 1>} : vector<20x20xi32>
    %cst_14 = arith.constant 0.000000e+00 : f32
    %14 = vector.broadcast %cst_14 : f32 to vector<20x20xf32>
    %15 = arith.cmpf ogt, %2, %14 : vector<20x20xf32>
    %16 = arith.cmpi eq, %12, %13 : vector<20x20xi32>
    %17 = arith.ori %15, %16 : vector<20x20xi1>
    %18 = vector.extract_strided_slice %5 {offsets = [0, 0], sizes = [1, 8], strides = [1, 1]} : vector<3x8xf32> to vector<1x8xf32>
    %19 = vector.extract_strided_slice %5 {offsets = [1, 0], sizes = [1, 8], strides = [1, 1]} : vector<3x8xf32> to vector<1x8xf32>
    %20 = vector.extract_strided_slice %5 {offsets = [2, 0], sizes = [1, 8], strides = [1, 1]} : vector<3x8xf32> to vector<1x8xf32>
    %21 = vector.extract_strided_slice %10 {offsets = [0, 8], sizes = [20, 1], strides = [1, 1]} : vector<20x9xf32> to vector<20x1xf32>
    %22 = vector.broadcast %21 : vector<20x1xf32> to vector<20x20xf32>
    %23 = vector.broadcast %11 : vector<1x20xf32> to vector<20x20xf32>
    %24 = arith.addf %22, %23 : vector<20x20xf32>
    %cst_15 = arith.constant 0.000000e+00 : f32
    %25 = vector.broadcast %cst_15 : f32 to vector<20x20xf32>
    %26 = arith.cmpf ogt, %24, %25 : vector<20x20xf32>
    %cst_16 = arith.constant 2.000000e-01 : f32
    %27 = vector.broadcast %cst_16 : f32 to vector<20x20xf32>
    %28 = arith.mulf %27, %24 : vector<20x20xf32>
    %29 = arith.select %26, %24, %28 : vector<20x20xi1>, vector<20x20xf32>
    %cst_17 = arith.constant -1.000000e+30 : f32
    %30 = vector.broadcast %cst_17 : f32 to vector<20x20xf32>
    %31 = arith.select %17, %29, %30 : vector<20x20xi1>, vector<20x20xf32>
    %cst_18 = arith.constant dense<0xFF800000> : vector<20xf32>
    %32 = vector.multi_reduction <maximumf>, %31, %cst_18 [1] : vector<20x20xf32> to vector<20xf32>
    %33 = vector.shape_cast %32 : vector<20xf32> to vector<20x1xf32>
    %34 = vector.broadcast %33 : vector<20x1xf32> to vector<20x20xf32>
    %35 = arith.subf %31, %34 : vector<20x20xf32>
    %36 = math.exp %35 : vector<20x20xf32>
    %cst_19 = arith.constant dense<0.000000e+00> : vector<20xf32>
    %37 = vector.multi_reduction <add>, %36, %cst_19 [1] : vector<20x20xf32> to vector<20xf32>
    %38 = vector.shape_cast %37 : vector<20xf32> to vector<20x1xf32>
    %39 = tpu.reciprocal %38 {approx = true} : vector<20x1xf32> -> vector<20x1xf32>
    %40 = vector.broadcast %39 : vector<20x1xf32> to vector<20x20xf32>
    %41 = arith.mulf %36, %40 : vector<20x20xf32>
    %42 = vector.extract_strided_slice %10 {offsets = [0, 0], sizes = [20, 8], strides = [1, 1]} : vector<20x9xf32> to vector<20x8xf32>
    %cst_20 = arith.constant dense<0.000000e+00> : vector<20x8xf32>
    %43 = tpu.matmul %41, %42, %cst_20 {dimension_numbers = #tpu.dot_dimension_numbers<[1], [0], [0], [1], [0, 0, 1, 1], [], []>} : vector<20x20xf32>, vector<20x8xf32>, vector<20x8xf32> -> vector<20x8xf32>
    %44 = vector.broadcast %18 : vector<1x8xf32> to vector<20x8xf32>
    %45 = arith.addf %43, %44 : vector<20x8xf32>
    %46 = math.tanh %45 : vector<20x8xf32>
    %47 = vector.broadcast %19 : vector<1x8xf32> to vector<20x8xf32>
    %48 = arith.mulf %46, %47 : vector<20x8xf32>
    %49 = vector.broadcast %20 : vector<1x8xf32> to vector<20x8xf32>
    %50 = arith.addf %48, %49 : vector<20x8xf32>
    %c0_21 = arith.constant 0 : index
    %c0_22 = arith.constant 0 : index
    %51 = vector.load %arg7[%c0_21, %c0_22] : memref<20x8xf32, #tpu.memory_space<vmem>>, vector<20x8xf32>
    tpu.vector_store %arg7[%c0_21, %c0_22], %50 {strides = array<i32>} : memref<20x8xf32, #tpu.memory_space<vmem>>, vector<20x8xf32>,
    %c0_23 = arith.constant 0 : index
    %c0_24 = arith.constant 0 : index
    %52 = vector.load %arg7[%c0_23, %c0_24] : memref<20x8xf32, #tpu.memory_space<vmem>>, vector<20x8xf32>
    %c0_25 = arith.constant 0 : index
    %c0_26 = arith.constant 0 : index
    %53 = vector.load %arg6[%c0_25, %c0_26] : memref<8x1xf32, #tpu.memory_space<vmem>>, vector<8x1xf32>
    %cst_27 = arith.constant dense<0.000000e+00> : vector<20x1xf32>
    %54 = tpu.matmul %52, %53, %cst_27 {dimension_numbers = #tpu.dot_dimension_numbers<[1], [0], [0], [1], [0, 0, 1, 1], [], []>} : vector<20x8xf32>, vector<8x1xf32>, vector<20x1xf32> -> vector<20x1xf32>
    %55 = arith.mulf %53, %53 : vector<8x1xf32>
    %56 = vector.shape_cast %55 : vector<8x1xf32> to vector<1x8x1xf32>
    %cst_28 = arith.constant dense<0.000000e+00> : vector<1xf32>
    %57 = vector.multi_reduction <add>, %56, %cst_28 [1, 2] : vector<1x8x1xf32> to vector<1xf32>
    %58 = vector.shape_cast %57 : vector<1xf32> to vector<1x1x1xf32>
    %59 = vector.extract %58[0, 0, 0] : f32 from vector<1x1x1xf32>
    %60 = math.rsqrt %59 : f32
    %61 = vector.broadcast %60 : f32 to vector<20x1xf32>
    %62 = arith.mulf %54, %61 : vector<20x1xf32>
    %63 = math.tanh %62 : vector<20x1xf32>
    %c0_29 = arith.constant 0 : index
    %c0_30 = arith.constant 0 : index
    %64 = vector.load %arg8[%c0_29, %c0_30] : memref<20x1xf32, #tpu.memory_space<vmem>>, vector<20x1xf32>
    tpu.vector_store %arg8[%c0_29, %c0_30], %63 {strides = array<i32>} : memref<20x1xf32, #tpu.memory_space<vmem>>, vector<20x1xf32>,
    %65 = vector.broadcast %63 : vector<20x1xf32> to vector<20x8xf32>
    %66 = arith.mulf %52, %65 : vector<20x8xf32>
    %c0_31 = arith.constant 0 : index
    %c0_32 = arith.constant 0 : index
    %67 = vector.load %arg7[%c0_31, %c0_32] : memref<20x8xf32, #tpu.memory_space<vmem>>, vector<20x8xf32>
    tpu.vector_store %arg7[%c0_31, %c0_32], %66 {strides = array<i32>} : memref<20x8xf32, #tpu.memory_space<vmem>>, vector<20x8xf32>,
    return
  }
}

module attributes {stable_mosaic.version = 11 : i64} {
  func.func @_pool_mlp_kernel(%arg0: memref<12x8xf32, #tpu.memory_space<vmem>>, %arg1: memref<9x8xf32, #tpu.memory_space<vmem>>, %arg2: memref<9x16xf32, #tpu.memory_space<vmem>>, %arg3: memref<4x16xf32, #tpu.memory_space<vmem>>) attributes {dimension_semantics = [], scalar_prefetch = 0 : i64, scratch_operands = 0 : i64, tpu.core_type = #tpu.core_type<tc>} {
    %c0 = arith.constant 0 : index
    %c0_0 = arith.constant 0 : index
    %0 = vector.load %arg0[%c0, %c0_0] : memref<12x8xf32, #tpu.memory_space<vmem>>, vector<12x8xf32>
    %1 = vector.extract_strided_slice %0 {offsets = [0, 0], sizes = [3, 8], strides = [1, 1]} : vector<12x8xf32> to vector<3x8xf32>
    %cst = arith.constant dense<0xFF800000> : vector<8xf32>
    %2 = vector.multi_reduction <maximumf>, %1, %cst [0] : vector<3x8xf32> to vector<8xf32>
    %3 = vector.shape_cast %2 : vector<8xf32> to vector<1x8xf32>
    %4 = vector.extract_strided_slice %0 {offsets = [3, 0], sizes = [3, 8], strides = [1, 1]} : vector<12x8xf32> to vector<3x8xf32>
    %cst_1 = arith.constant dense<0xFF800000> : vector<8xf32>
    %5 = vector.multi_reduction <maximumf>, %4, %cst_1 [0] : vector<3x8xf32> to vector<8xf32>
    %6 = vector.shape_cast %5 : vector<8xf32> to vector<1x8xf32>
    %7 = vector.extract_strided_slice %0 {offsets = [6, 0], sizes = [3, 8], strides = [1, 1]} : vector<12x8xf32> to vector<3x8xf32>
    %cst_2 = arith.constant dense<0xFF800000> : vector<8xf32>
    %8 = vector.multi_reduction <maximumf>, %7, %cst_2 [0] : vector<3x8xf32> to vector<8xf32>
    %9 = vector.shape_cast %8 : vector<8xf32> to vector<1x8xf32>
    %10 = vector.extract_strided_slice %0 {offsets = [9, 0], sizes = [3, 8], strides = [1, 1]} : vector<12x8xf32> to vector<3x8xf32>
    %cst_3 = arith.constant dense<0xFF800000> : vector<8xf32>
    %11 = vector.multi_reduction <maximumf>, %10, %cst_3 [0] : vector<3x8xf32> to vector<8xf32>
    %12 = vector.shape_cast %11 : vector<8xf32> to vector<1x8xf32>
    %13 = tpu.concatenate %3, %6, %9, %12 in 0 : vector<1x8xf32>, vector<1x8xf32>, vector<1x8xf32>, vector<1x8xf32> -> vector<4x8xf32>
    %cst_4 = arith.constant 0.000000e+00 : f32
    %14 = vector.broadcast %cst_4 : f32 to vector<4x8xf32>
    %15 = arith.maximumf %13, %14 : vector<4x8xf32>
    %c0_5 = arith.constant 0 : index
    %c0_6 = arith.constant 0 : index
    %16 = vector.load %arg1[%c0_5, %c0_6] : memref<9x8xf32, #tpu.memory_space<vmem>>, vector<9x8xf32>
    %c0_7 = arith.constant 0 : index
    %c0_8 = arith.constant 0 : index
    %17 = vector.load %arg2[%c0_7, %c0_8] : memref<9x16xf32, #tpu.memory_space<vmem>>, vector<9x16xf32>
    %18 = vector.extract_strided_slice %16 {offsets = [0, 0], sizes = [8, 8], strides = [1, 1]} : vector<9x8xf32> to vector<8x8xf32>
    %cst_9 = arith.constant dense<0.000000e+00> : vector<4x8xf32>
    %19 = tpu.matmul %15, %18, %cst_9 {dimension_numbers = #tpu.dot_dimension_numbers<[1], [0], [0], [1], [0, 0, 1, 1], [], []>} : vector<4x8xf32>, vector<8x8xf32>, vector<4x8xf32> -> vector<4x8xf32>
    %20 = vector.extract_strided_slice %16 {offsets = [8, 0], sizes = [1, 8], strides = [1, 1]} : vector<9x8xf32> to vector<1x8xf32>
    %21 = vector.broadcast %20 : vector<1x8xf32> to vector<4x8xf32>
    %22 = arith.addf %19, %21 : vector<4x8xf32>
    %cst_10 = arith.constant 0.000000e+00 : f32
    %23 = vector.broadcast %cst_10 : f32 to vector<4x8xf32>
    %24 = arith.maximumf %22, %23 : vector<4x8xf32>
    %25 = vector.extract_strided_slice %17 {offsets = [0, 0], sizes = [8, 16], strides = [1, 1]} : vector<9x16xf32> to vector<8x16xf32>
    %cst_11 = arith.constant dense<0.000000e+00> : vector<4x16xf32>
    %26 = tpu.matmul %24, %25, %cst_11 {dimension_numbers = #tpu.dot_dimension_numbers<[1], [0], [0], [1], [0, 0, 1, 1], [], []>} : vector<4x8xf32>, vector<8x16xf32>, vector<4x16xf32> -> vector<4x16xf32>
    %27 = vector.extract_strided_slice %17 {offsets = [8, 0], sizes = [1, 16], strides = [1, 1]} : vector<9x16xf32> to vector<1x16xf32>
    %28 = vector.broadcast %27 : vector<1x16xf32> to vector<4x16xf32>
    %29 = arith.addf %26, %28 : vector<4x16xf32>
    %c0_12 = arith.constant 0 : index
    %c0_13 = arith.constant 0 : index
    %30 = vector.load %arg3[%c0_12, %c0_13] : memref<4x16xf32, #tpu.memory_space<vmem>>, vector<4x16xf32>
    tpu.vector_store %arg3[%c0_12, %c0_13], %29 {strides = array<i32>} : memref<4x16xf32, #tpu.memory_space<vmem>>, vector<4x16xf32>,
    return
  }
}

module attributes {stable_mosaic.version = 11 : i64} {
  func.func @_gat_kernel(%arg0: memref<4x16xf32, #tpu.memory_space<vmem>>, %arg1: memref<16x4xf32, #tpu.memory_space<vmem>>, %arg2: memref<4x4xf32, #tpu.memory_space<vmem>>, %arg3: memref<16x27xf32, #tpu.memory_space<vmem>>, %arg4: memref<3x16xf32, #tpu.memory_space<vmem>>, %arg5: memref<3x24xf32, #tpu.memory_space<vmem>>, %arg6: memref<4x24xf32, #tpu.memory_space<vmem>>) attributes {dimension_semantics = [], scalar_prefetch = 0 : i64, scratch_operands = 0 : i64, tpu.core_type = #tpu.core_type<tc>} {
    %c0 = arith.constant 0 : index
    %c0_0 = arith.constant 0 : index
    %0 = vector.load %arg0[%c0, %c0_0] : memref<4x16xf32, #tpu.memory_space<vmem>>, vector<4x16xf32>
    %c0_1 = arith.constant 0 : index
    %c0_2 = arith.constant 0 : index
    %1 = vector.load %arg1[%c0_1, %c0_2] : memref<16x4xf32, #tpu.memory_space<vmem>>, vector<16x4xf32>
    %c0_3 = arith.constant 0 : index
    %c0_4 = arith.constant 0 : index
    %2 = vector.load %arg2[%c0_3, %c0_4] : memref<4x4xf32, #tpu.memory_space<vmem>>, vector<4x4xf32>
    %c0_5 = arith.constant 0 : index
    %c0_6 = arith.constant 0 : index
    %3 = vector.load %arg3[%c0_5, %c0_6] : memref<16x27xf32, #tpu.memory_space<vmem>>, vector<16x27xf32>
    %c0_7 = arith.constant 0 : index
    %c0_8 = arith.constant 0 : index
    %4 = vector.load %arg4[%c0_7, %c0_8] : memref<3x16xf32, #tpu.memory_space<vmem>>, vector<3x16xf32>
    %c0_9 = arith.constant 0 : index
    %c0_10 = arith.constant 0 : index
    %5 = vector.load %arg5[%c0_9, %c0_10] : memref<3x24xf32, #tpu.memory_space<vmem>>, vector<3x24xf32>
    %cst = arith.constant dense<0.000000e+00> : vector<4x27xf32>
    %6 = tpu.matmul %0, %3, %cst {dimension_numbers = #tpu.dot_dimension_numbers<[1], [0], [0], [1], [0, 0, 1, 1], [], []>} : vector<4x16xf32>, vector<16x27xf32>, vector<4x27xf32> -> vector<4x27xf32>
    %cst_11 = arith.constant dense<0.000000e+00> : vector<3x4xf32>
    %7 = tpu.matmul %4, %1, %cst_11 {dimension_numbers = #tpu.dot_dimension_numbers<[1], [0], [0], [1], [0, 0, 1, 1], [], []>} : vector<3x16xf32>, vector<16x4xf32>, vector<3x4xf32> -> vector<3x4xf32>
    %8 = tpu.iota {dimensions = array<i32: 0>} : vector<4x4xi32>
    %9 = tpu.iota {dimensions = array<i32: 1>} : vector<4x4xi32>
    %cst_12 = arith.constant 0.000000e+00 : f32
    %10 = vector.broadcast %cst_12 : f32 to vector<4x4xf32>
    %11 = arith.cmpf ogt, %2, %10 : vector<4x4xf32>
    %12 = arith.cmpi eq, %8, %9 : vector<4x4xi32>
    %13 = arith.ori %11, %12 : vector<4x4xi1>
    %14 = vector.extract_strided_slice %5 {offsets = [0, 0], sizes = [1, 24], strides = [1, 1]} : vector<3x24xf32> to vector<1x24xf32>
    %15 = vector.extract_strided_slice %5 {offsets = [1, 0], sizes = [1, 24], strides = [1, 1]} : vector<3x24xf32> to vector<1x24xf32>
    %16 = vector.extract_strided_slice %5 {offsets = [2, 0], sizes = [1, 24], strides = [1, 1]} : vector<3x24xf32> to vector<1x24xf32>
    %17 = vector.extract_strided_slice %6 {offsets = [0, 24], sizes = [4, 1], strides = [1, 1]} : vector<4x27xf32> to vector<4x1xf32>
    %18 = vector.extract_strided_slice %7 {offsets = [0, 0], sizes = [1, 4], strides = [1, 1]} : vector<3x4xf32> to vector<1x4xf32>
    %19 = vector.broadcast %17 : vector<4x1xf32> to vector<4x4xf32>
    %20 = vector.broadcast %18 : vector<1x4xf32> to vector<4x4xf32>
    %21 = arith.addf %19, %20 : vector<4x4xf32>
    %cst_13 = arith.constant 0.000000e+00 : f32
    %22 = vector.broadcast %cst_13 : f32 to vector<4x4xf32>
    %23 = arith.cmpf ogt, %21, %22 : vector<4x4xf32>
    %cst_14 = arith.constant 2.000000e-01 : f32
    %24 = vector.broadcast %cst_14 : f32 to vector<4x4xf32>
    %25 = arith.mulf %24, %21 : vector<4x4xf32>
    %26 = arith.select %23, %21, %25 : vector<4x4xi1>, vector<4x4xf32>
    %cst_15 = arith.constant -1.000000e+30 : f32
    %27 = vector.broadcast %cst_15 : f32 to vector<4x4xf32>
    %28 = arith.select %13, %26, %27 : vector<4x4xi1>, vector<4x4xf32>
    %cst_16 = arith.constant dense<0xFF800000> : vector<4xf32>
    %29 = vector.multi_reduction <maximumf>, %28, %cst_16 [1] : vector<4x4xf32> to vector<4xf32>
    %30 = vector.shape_cast %29 : vector<4xf32> to vector<4x1xf32>
    %31 = vector.broadcast %30 : vector<4x1xf32> to vector<4x4xf32>
    %32 = arith.subf %28, %31 : vector<4x4xf32>
    %33 = math.exp %32 : vector<4x4xf32>
    %cst_17 = arith.constant dense<0.000000e+00> : vector<4xf32>
    %34 = vector.multi_reduction <add>, %33, %cst_17 [1] : vector<4x4xf32> to vector<4xf32>
    %35 = vector.shape_cast %34 : vector<4xf32> to vector<4x1xf32>
    %36 = tpu.reciprocal %35 {approx = true} : vector<4x1xf32> -> vector<4x1xf32>
    %37 = vector.broadcast %36 : vector<4x1xf32> to vector<4x4xf32>
    %38 = arith.mulf %33, %37 : vector<4x4xf32>
    %39 = vector.extract_strided_slice %6 {offsets = [0, 0], sizes = [4, 8], strides = [1, 1]} : vector<4x27xf32> to vector<4x8xf32>
    %cst_18 = arith.constant dense<0.000000e+00> : vector<4x8xf32>
    %40 = tpu.matmul %38, %39, %cst_18 {dimension_numbers = #tpu.dot_dimension_numbers<[1], [0], [0], [1], [0, 0, 1, 1], [], []>} : vector<4x4xf32>, vector<4x8xf32>, vector<4x8xf32> -> vector<4x8xf32>
    %41 = vector.extract_strided_slice %14 {offsets = [0, 0], sizes = [1, 8], strides = [1, 1]} : vector<1x24xf32> to vector<1x8xf32>
    %42 = vector.broadcast %41 : vector<1x8xf32> to vector<4x8xf32>
    %43 = arith.addf %40, %42 : vector<4x8xf32>
    %44 = math.tanh %43 : vector<4x8xf32>
    %45 = vector.extract_strided_slice %15 {offsets = [0, 0], sizes = [1, 8], strides = [1, 1]} : vector<1x24xf32> to vector<1x8xf32>
    %46 = vector.broadcast %45 : vector<1x8xf32> to vector<4x8xf32>
    %47 = arith.mulf %44, %46 : vector<4x8xf32>
    %48 = vector.extract_strided_slice %16 {offsets = [0, 0], sizes = [1, 8], strides = [1, 1]} : vector<1x24xf32> to vector<1x8xf32>
    %49 = vector.broadcast %48 : vector<1x8xf32> to vector<4x8xf32>
    %50 = arith.addf %47, %49 : vector<4x8xf32>
    %c0_19 = arith.constant 0 : index
    %c0_20 = arith.constant 0 : index
    %51 = vector.load %arg6[%c0_19, %c0_20] : memref<4x24xf32, #tpu.memory_space<vmem>>, vector<4x8xf32>
    tpu.vector_store %arg6[%c0_19, %c0_20], %50 {strides = array<i32>} : memref<4x24xf32, #tpu.memory_space<vmem>>, vector<4x8xf32>,
    %52 = vector.extract_strided_slice %6 {offsets = [0, 25], sizes = [4, 1], strides = [1, 1]} : vector<4x27xf32> to vector<4x1xf32>
    %53 = vector.extract_strided_slice %7 {offsets = [1, 0], sizes = [1, 4], strides = [1, 1]} : vector<3x4xf32> to vector<1x4xf32>
    %54 = vector.broadcast %52 : vector<4x1xf32> to vector<4x4xf32>
    %55 = vector.broadcast %53 : vector<1x4xf32> to vector<4x4xf32>
    %56 = arith.addf %54, %55 : vector<4x4xf32>
    %cst_21 = arith.constant 0.000000e+00 : f32
    %57 = vector.broadcast %cst_21 : f32 to vector<4x4xf32>
    %58 = arith.cmpf ogt, %56, %57 : vector<4x4xf32>
    %cst_22 = arith.constant 2.000000e-01 : f32
    %59 = vector.broadcast %cst_22 : f32 to vector<4x4xf32>
    %60 = arith.mulf %59, %56 : vector<4x4xf32>
    %61 = arith.select %58, %56, %60 : vector<4x4xi1>, vector<4x4xf32>
    %cst_23 = arith.constant -1.000000e+30 : f32
    %62 = vector.broadcast %cst_23 : f32 to vector<4x4xf32>
    %63 = arith.select %13, %61, %62 : vector<4x4xi1>, vector<4x4xf32>
    %cst_24 = arith.constant dense<0xFF800000> : vector<4xf32>
    %64 = vector.multi_reduction <maximumf>, %63, %cst_24 [1] : vector<4x4xf32> to vector<4xf32>
    %65 = vector.shape_cast %64 : vector<4xf32> to vector<4x1xf32>
    %66 = vector.broadcast %65 : vector<4x1xf32> to vector<4x4xf32>
    %67 = arith.subf %63, %66 : vector<4x4xf32>
    %68 = math.exp %67 : vector<4x4xf32>
    %cst_25 = arith.constant dense<0.000000e+00> : vector<4xf32>
    %69 = vector.multi_reduction <add>, %68, %cst_25 [1] : vector<4x4xf32> to vector<4xf32>
    %70 = vector.shape_cast %69 : vector<4xf32> to vector<4x1xf32>
    %71 = tpu.reciprocal %70 {approx = true} : vector<4x1xf32> -> vector<4x1xf32>
    %72 = vector.broadcast %71 : vector<4x1xf32> to vector<4x4xf32>
    %73 = arith.mulf %68, %72 : vector<4x4xf32>
    %74 = vector.extract_strided_slice %6 {offsets = [0, 8], sizes = [4, 8], strides = [1, 1]} : vector<4x27xf32> to vector<4x8xf32>
    %cst_26 = arith.constant dense<0.000000e+00> : vector<4x8xf32>
    %75 = tpu.matmul %73, %74, %cst_26 {dimension_numbers = #tpu.dot_dimension_numbers<[1], [0], [0], [1], [0, 0, 1, 1], [], []>} : vector<4x4xf32>, vector<4x8xf32>, vector<4x8xf32> -> vector<4x8xf32>
    %76 = vector.extract_strided_slice %14 {offsets = [0, 8], sizes = [1, 8], strides = [1, 1]} : vector<1x24xf32> to vector<1x8xf32>
    %77 = vector.broadcast %76 : vector<1x8xf32> to vector<4x8xf32>
    %78 = arith.addf %75, %77 : vector<4x8xf32>
    %79 = math.tanh %78 : vector<4x8xf32>
    %80 = vector.extract_strided_slice %15 {offsets = [0, 8], sizes = [1, 8], strides = [1, 1]} : vector<1x24xf32> to vector<1x8xf32>
    %81 = vector.broadcast %80 : vector<1x8xf32> to vector<4x8xf32>
    %82 = arith.mulf %79, %81 : vector<4x8xf32>
    %83 = vector.extract_strided_slice %16 {offsets = [0, 8], sizes = [1, 8], strides = [1, 1]} : vector<1x24xf32> to vector<1x8xf32>
    %84 = vector.broadcast %83 : vector<1x8xf32> to vector<4x8xf32>
    %85 = arith.addf %82, %84 : vector<4x8xf32>
    %c0_27 = arith.constant 0 : index
    %c8 = arith.constant 8 : index
    %86 = vector.load %arg6[%c0_27, %c8] : memref<4x24xf32, #tpu.memory_space<vmem>>, vector<4x8xf32>
    tpu.vector_store %arg6[%c0_27, %c8], %85 {strides = array<i32>} : memref<4x24xf32, #tpu.memory_space<vmem>>, vector<4x8xf32>,
    %87 = vector.extract_strided_slice %6 {offsets = [0, 26], sizes = [4, 1], strides = [1, 1]} : vector<4x27xf32> to vector<4x1xf32>
    %88 = vector.extract_strided_slice %7 {offsets = [2, 0], sizes = [1, 4], strides = [1, 1]} : vector<3x4xf32> to vector<1x4xf32>
    %89 = vector.broadcast %87 : vector<4x1xf32> to vector<4x4xf32>
    %90 = vector.broadcast %88 : vector<1x4xf32> to vector<4x4xf32>
    %91 = arith.addf %89, %90 : vector<4x4xf32>
    %cst_28 = arith.constant 0.000000e+00 : f32
    %92 = vector.broadcast %cst_28 : f32 to vector<4x4xf32>
    %93 = arith.cmpf ogt, %91, %92 : vector<4x4xf32>
    %cst_29 = arith.constant 2.000000e-01 : f32
    %94 = vector.broadcast %cst_29 : f32 to vector<4x4xf32>
    %95 = arith.mulf %94, %91 : vector<4x4xf32>
    %96 = arith.select %93, %91, %95 : vector<4x4xi1>, vector<4x4xf32>
    %cst_30 = arith.constant -1.000000e+30 : f32
    %97 = vector.broadcast %cst_30 : f32 to vector<4x4xf32>
    %98 = arith.select %13, %96, %97 : vector<4x4xi1>, vector<4x4xf32>
    %cst_31 = arith.constant dense<0xFF800000> : vector<4xf32>
    %99 = vector.multi_reduction <maximumf>, %98, %cst_31 [1] : vector<4x4xf32> to vector<4xf32>
    %100 = vector.shape_cast %99 : vector<4xf32> to vector<4x1xf32>
    %101 = vector.broadcast %100 : vector<4x1xf32> to vector<4x4xf32>
    %102 = arith.subf %98, %101 : vector<4x4xf32>
    %103 = math.exp %102 : vector<4x4xf32>
    %cst_32 = arith.constant dense<0.000000e+00> : vector<4xf32>
    %104 = vector.multi_reduction <add>, %103, %cst_32 [1] : vector<4x4xf32> to vector<4xf32>
    %105 = vector.shape_cast %104 : vector<4xf32> to vector<4x1xf32>
    %106 = tpu.reciprocal %105 {approx = true} : vector<4x1xf32> -> vector<4x1xf32>
    %107 = vector.broadcast %106 : vector<4x1xf32> to vector<4x4xf32>
    %108 = arith.mulf %103, %107 : vector<4x4xf32>
    %109 = vector.extract_strided_slice %6 {offsets = [0, 16], sizes = [4, 8], strides = [1, 1]} : vector<4x27xf32> to vector<4x8xf32>
    %cst_33 = arith.constant dense<0.000000e+00> : vector<4x8xf32>
    %110 = tpu.matmul %108, %109, %cst_33 {dimension_numbers = #tpu.dot_dimension_numbers<[1], [0], [0], [1], [0, 0, 1, 1], [], []>} : vector<4x4xf32>, vector<4x8xf32>, vector<4x8xf32> -> vector<4x8xf32>
    %111 = vector.extract_strided_slice %14 {offsets = [0, 16], sizes = [1, 8], strides = [1, 1]} : vector<1x24xf32> to vector<1x8xf32>
    %112 = vector.broadcast %111 : vector<1x8xf32> to vector<4x8xf32>
    %113 = arith.addf %110, %112 : vector<4x8xf32>
    %114 = math.tanh %113 : vector<4x8xf32>
    %115 = vector.extract_strided_slice %15 {offsets = [0, 16], sizes = [1, 8], strides = [1, 1]} : vector<1x24xf32> to vector<1x8xf32>
    %116 = vector.broadcast %115 : vector<1x8xf32> to vector<4x8xf32>
    %117 = arith.mulf %114, %116 : vector<4x8xf32>
    %118 = vector.extract_strided_slice %16 {offsets = [0, 16], sizes = [1, 8], strides = [1, 1]} : vector<1x24xf32> to vector<1x8xf32>
    %119 = vector.broadcast %118 : vector<1x8xf32> to vector<4x8xf32>
    %120 = arith.addf %117, %119 : vector<4x8xf32>
    %c0_34 = arith.constant 0 : index
    %c16 = arith.constant 16 : index
    %121 = vector.load %arg6[%c0_34, %c16] : memref<4x24xf32, #tpu.memory_space<vmem>>, vector<4x8xf32>
    tpu.vector_store %arg6[%c0_34, %c16], %120 {strides = array<i32>} : memref<4x24xf32, #tpu.memory_space<vmem>>, vector<4x8xf32>,
    return
  }
}

module attributes {stable_mosaic.version = 11 : i64} {
  func.func @_gat_mlp_sigmoid_kernel(%arg0: memref<4x24xf32, #tpu.memory_space<vmem>>, %arg1: memref<24x4xf32, #tpu.memory_space<vmem>>, %arg2: memref<4x4xf32, #tpu.memory_space<vmem>>, %arg3: memref<24x9xf32, #tpu.memory_space<vmem>>, %arg4: memref<1x24xf32, #tpu.memory_space<vmem>>, %arg5: memref<3x8xf32, #tpu.memory_space<vmem>>, %arg6: memref<9x8xf32, #tpu.memory_space<vmem>>, %arg7: memref<9x1xf32, #tpu.memory_space<vmem>>, %arg8: memref<4x1xf32, #tpu.memory_space<vmem>>, %arg9: memref<4x8xf32, #tpu.memory_space<vmem>>) attributes {dimension_semantics = [], scalar_prefetch = 0 : i64, scratch_operands = 1 : i64, tpu.core_type = #tpu.core_type<tc>} {
    %c0 = arith.constant 0 : index
    %c0_0 = arith.constant 0 : index
    %0 = vector.load %arg0[%c0, %c0_0] : memref<4x24xf32, #tpu.memory_space<vmem>>, vector<4x24xf32>
    %c0_1 = arith.constant 0 : index
    %c0_2 = arith.constant 0 : index
    %1 = vector.load %arg1[%c0_1, %c0_2] : memref<24x4xf32, #tpu.memory_space<vmem>>, vector<24x4xf32>
    %c0_3 = arith.constant 0 : index
    %c0_4 = arith.constant 0 : index
    %2 = vector.load %arg2[%c0_3, %c0_4] : memref<4x4xf32, #tpu.memory_space<vmem>>, vector<4x4xf32>
    %c0_5 = arith.constant 0 : index
    %c0_6 = arith.constant 0 : index
    %3 = vector.load %arg3[%c0_5, %c0_6] : memref<24x9xf32, #tpu.memory_space<vmem>>, vector<24x9xf32>
    %c0_7 = arith.constant 0 : index
    %c0_8 = arith.constant 0 : index
    %4 = vector.load %arg4[%c0_7, %c0_8] : memref<1x24xf32, #tpu.memory_space<vmem>>, vector<1x24xf32>
    %c0_9 = arith.constant 0 : index
    %c0_10 = arith.constant 0 : index
    %5 = vector.load %arg5[%c0_9, %c0_10] : memref<3x8xf32, #tpu.memory_space<vmem>>, vector<3x8xf32>
    %cst = arith.constant dense<0.000000e+00> : vector<4x9xf32>
    %6 = tpu.matmul %0, %3, %cst {dimension_numbers = #tpu.dot_dimension_numbers<[1], [0], [0], [1], [0, 0, 1, 1], [], []>} : vector<4x24xf32>, vector<24x9xf32>, vector<4x9xf32> -> vector<4x9xf32>
    %cst_11 = arith.constant dense<0.000000e+00> : vector<1x4xf32>
    %7 = tpu.matmul %4, %1, %cst_11 {dimension_numbers = #tpu.dot_dimension_numbers<[1], [0], [0], [1], [0, 0, 1, 1], [], []>} : vector<1x24xf32>, vector<24x4xf32>, vector<1x4xf32> -> vector<1x4xf32>
    %8 = tpu.iota {dimensions = array<i32: 0>} : vector<4x4xi32>
    %9 = tpu.iota {dimensions = array<i32: 1>} : vector<4x4xi32>
    %cst_12 = arith.constant 0.000000e+00 : f32
    %10 = vector.broadcast %cst_12 : f32 to vector<4x4xf32>
    %11 = arith.cmpf ogt, %2, %10 : vector<4x4xf32>
    %12 = arith.cmpi eq, %8, %9 : vector<4x4xi32>
    %13 = arith.ori %11, %12 : vector<4x4xi1>
    %14 = vector.extract_strided_slice %5 {offsets = [0, 0], sizes = [1, 8], strides = [1, 1]} : vector<3x8xf32> to vector<1x8xf32>
    %15 = vector.extract_strided_slice %5 {offsets = [1, 0], sizes = [1, 8], strides = [1, 1]} : vector<3x8xf32> to vector<1x8xf32>
    %16 = vector.extract_strided_slice %5 {offsets = [2, 0], sizes = [1, 8], strides = [1, 1]} : vector<3x8xf32> to vector<1x8xf32>
    %17 = vector.extract_strided_slice %6 {offsets = [0, 8], sizes = [4, 1], strides = [1, 1]} : vector<4x9xf32> to vector<4x1xf32>
    %18 = vector.broadcast %17 : vector<4x1xf32> to vector<4x4xf32>
    %19 = vector.broadcast %7 : vector<1x4xf32> to vector<4x4xf32>
    %20 = arith.addf %18, %19 : vector<4x4xf32>
    %cst_13 = arith.constant 0.000000e+00 : f32
    %21 = vector.broadcast %cst_13 : f32 to vector<4x4xf32>
    %22 = arith.cmpf ogt, %20, %21 : vector<4x4xf32>
    %cst_14 = arith.constant 2.000000e-01 : f32
    %23 = vector.broadcast %cst_14 : f32 to vector<4x4xf32>
    %24 = arith.mulf %23, %20 : vector<4x4xf32>
    %25 = arith.select %22, %20, %24 : vector<4x4xi1>, vector<4x4xf32>
    %cst_15 = arith.constant -1.000000e+30 : f32
    %26 = vector.broadcast %cst_15 : f32 to vector<4x4xf32>
    %27 = arith.select %13, %25, %26 : vector<4x4xi1>, vector<4x4xf32>
    %cst_16 = arith.constant dense<0xFF800000> : vector<4xf32>
    %28 = vector.multi_reduction <maximumf>, %27, %cst_16 [1] : vector<4x4xf32> to vector<4xf32>
    %29 = vector.shape_cast %28 : vector<4xf32> to vector<4x1xf32>
    %30 = vector.broadcast %29 : vector<4x1xf32> to vector<4x4xf32>
    %31 = arith.subf %27, %30 : vector<4x4xf32>
    %32 = math.exp %31 : vector<4x4xf32>
    %cst_17 = arith.constant dense<0.000000e+00> : vector<4xf32>
    %33 = vector.multi_reduction <add>, %32, %cst_17 [1] : vector<4x4xf32> to vector<4xf32>
    %34 = vector.shape_cast %33 : vector<4xf32> to vector<4x1xf32>
    %35 = tpu.reciprocal %34 {approx = true} : vector<4x1xf32> -> vector<4x1xf32>
    %36 = vector.broadcast %35 : vector<4x1xf32> to vector<4x4xf32>
    %37 = arith.mulf %32, %36 : vector<4x4xf32>
    %38 = vector.extract_strided_slice %6 {offsets = [0, 0], sizes = [4, 8], strides = [1, 1]} : vector<4x9xf32> to vector<4x8xf32>
    %cst_18 = arith.constant dense<0.000000e+00> : vector<4x8xf32>
    %39 = tpu.matmul %37, %38, %cst_18 {dimension_numbers = #tpu.dot_dimension_numbers<[1], [0], [0], [1], [0, 0, 1, 1], [], []>} : vector<4x4xf32>, vector<4x8xf32>, vector<4x8xf32> -> vector<4x8xf32>
    %40 = vector.broadcast %14 : vector<1x8xf32> to vector<4x8xf32>
    %41 = arith.addf %39, %40 : vector<4x8xf32>
    %42 = math.tanh %41 : vector<4x8xf32>
    %43 = vector.broadcast %15 : vector<1x8xf32> to vector<4x8xf32>
    %44 = arith.mulf %42, %43 : vector<4x8xf32>
    %45 = vector.broadcast %16 : vector<1x8xf32> to vector<4x8xf32>
    %46 = arith.addf %44, %45 : vector<4x8xf32>
    %c0_19 = arith.constant 0 : index
    %c0_20 = arith.constant 0 : index
    %47 = vector.load %arg9[%c0_19, %c0_20] : memref<4x8xf32, #tpu.memory_space<vmem>>, vector<4x8xf32>
    tpu.vector_store %arg9[%c0_19, %c0_20], %46 {strides = array<i32>} : memref<4x8xf32, #tpu.memory_space<vmem>>, vector<4x8xf32>,
    %c0_21 = arith.constant 0 : index
    %c0_22 = arith.constant 0 : index
    %48 = vector.load %arg9[%c0_21, %c0_22] : memref<4x8xf32, #tpu.memory_space<vmem>>, vector<4x8xf32>
    %c0_23 = arith.constant 0 : index
    %c0_24 = arith.constant 0 : index
    %49 = vector.load %arg6[%c0_23, %c0_24] : memref<9x8xf32, #tpu.memory_space<vmem>>, vector<9x8xf32>
    %c0_25 = arith.constant 0 : index
    %c0_26 = arith.constant 0 : index
    %50 = vector.load %arg7[%c0_25, %c0_26] : memref<9x1xf32, #tpu.memory_space<vmem>>, vector<9x1xf32>
    %51 = vector.extract_strided_slice %49 {offsets = [0, 0], sizes = [8, 8], strides = [1, 1]} : vector<9x8xf32> to vector<8x8xf32>
    %cst_27 = arith.constant dense<0.000000e+00> : vector<4x8xf32>
    %52 = tpu.matmul %48, %51, %cst_27 {dimension_numbers = #tpu.dot_dimension_numbers<[1], [0], [0], [1], [0, 0, 1, 1], [], []>} : vector<4x8xf32>, vector<8x8xf32>, vector<4x8xf32> -> vector<4x8xf32>
    %53 = vector.extract_strided_slice %49 {offsets = [8, 0], sizes = [1, 8], strides = [1, 1]} : vector<9x8xf32> to vector<1x8xf32>
    %54 = vector.broadcast %53 : vector<1x8xf32> to vector<4x8xf32>
    %55 = arith.addf %52, %54 : vector<4x8xf32>
    %cst_28 = arith.constant 0.000000e+00 : f32
    %56 = vector.broadcast %cst_28 : f32 to vector<4x8xf32>
    %57 = arith.maximumf %55, %56 : vector<4x8xf32>
    %58 = vector.extract_strided_slice %50 {offsets = [0, 0], sizes = [8, 1], strides = [1, 1]} : vector<9x1xf32> to vector<8x1xf32>
    %cst_29 = arith.constant dense<0.000000e+00> : vector<4x1xf32>
    %59 = tpu.matmul %57, %58, %cst_29 {dimension_numbers = #tpu.dot_dimension_numbers<[1], [0], [0], [1], [0, 0, 1, 1], [], []>} : vector<4x8xf32>, vector<8x1xf32>, vector<4x1xf32> -> vector<4x1xf32>
    %60 = vector.extract_strided_slice %50 {offsets = [8, 0], sizes = [1, 1], strides = [1, 1]} : vector<9x1xf32> to vector<1x1xf32>
    %61 = vector.broadcast %60 : vector<1x1xf32> to vector<4x1xf32>
    %62 = arith.addf %59, %61 : vector<4x1xf32>
    %cst_30 = arith.constant 0.000000e+00 : f32
    %63 = vector.broadcast %cst_30 : f32 to vector<4x1xf32>
    %64 = arith.subf %63, %62 : vector<4x1xf32>
    %65 = math.exp %64 : vector<4x1xf32>
    %cst_31 = arith.constant 1.000000e+00 : f32
    %66 = vector.broadcast %cst_31 : f32 to vector<4x1xf32>
    %67 = arith.addf %66, %65 : vector<4x1xf32>
    %cst_32 = arith.constant 1.000000e+00 : f32
    %68 = vector.broadcast %cst_32 : f32 to vector<4x1xf32>
    %69 = arith.divf %68, %67 : vector<4x1xf32>
    %c0_33 = arith.constant 0 : index
    %c0_34 = arith.constant 0 : index
    %70 = vector.load %arg8[%c0_33, %c0_34] : memref<4x1xf32, #tpu.memory_space<vmem>>, vector<4x1xf32>
    tpu.vector_store %arg8[%c0_33, %c0_34], %69 {strides = array<i32>} : memref<4x1xf32, #tpu.memory_space<vmem>>, vector<4x1xf32>,
    return
  }
}

</mosaic_0001>

<bundles_post_ra>
// kernel: forward_probs.5
= control target key start
LH: loop header
LB: loop body
LE: loop exit
PB: predicated region body
PF: predicated region fallthrough
CT: control target
= control target key end

     0   :  { %v1165_v0 = vmov 0.0   ;;  %vm40_vm0 = vcmask 130048   ;;  %vm1166_vm1 = vmmov 0   ;;  %v1167_v9 = vmov 24   ;;  %s1171_s23 = smov 120   ;;  %s1172_s10 = smov 8   ;;  %s1573_s3 = inlined_call_operand.vmem [shape: f32[16,27], index: 3, kind: input, shape index: {}]   ;;  %s1574_s0 = inlined_call_operand.vmem [shape: f32[24,16], index: 0, kind: input, shape index: {}]   ;;  %s1575_s1 = inlined_call_operand.vmem [shape: f32[16,24], index: 1, kind: input, shape index: {}]   ;;  %s1576_s4 = inlined_call_operand.vmem [shape: f32[3,16], index: 4, kind: input, shape index: {}]   ;;  %s1577_s2 = inlined_call_operand.vmem [shape: f32[24,24], index: 2, kind: input, shape index: {}]   ;;  %s1578_s5 = inlined_call_operand.vmem [shape: f32[3,24], index: 5, kind: input, shape index: {}]   ;;  %s1579_s6 = inlined_call_operand.vmem [shape: f32[24,1], index: 6, kind: input, shape index: {}]   ;;  %s1580_s7 = inlined_call_operand.vmem [shape: f32[24,24], index: 7, kind: output, shape index: {0}]   ;;  %s1581_s8 = inlined_call_operand.vmem [shape: f32[24,1], index: 8, kind: output, shape index: {1}]  }
   0x1   :  { %998 = vmatprep.subr.mxu0 %v1165_v0  ;;  %1078 = vmatprep.subr.mxu1 %v1165_v0  ;;  %v37_v1 = vld [vmem:[%s1573_s3 + $0x8] sm:$0xff]  ;;  %v36_v2 = vld [vmem:[%s1573_s3] sm:$0xff]  ;;  %v30_v4 = vld [vmem:[%s1574_s0 + $0x10] sm:$0xff]  ;;  %v1168_v15 = vmov 25   ;;  %v1169_v19 = vmov 26   ;;  %v203_v20 = vlaneseq  ;;  %vm252_vm6 = vcmask 195584  }
   0x2   :  { %999 = vmatpush3.msra.mxu0 %v37_v1  ;;  %1080 = vmatpush3.msra.mxu1 %v37_v1  ;;  %v28_v3 = vld [vmem:[%s1574_s0] sm:$0xff]  ;;  %v32_v5 = vld [vmem:[%s1575_s1 + $0x8] sm:$0xff]  ;;  %v35_v30 = vld [vmem:[%s1577_s2 + $0x10] sm:$0xff]  ;;  %s1173_s14 = smov 16  }
   0x3   :  { %1000 = vmatprep.subr.mxu0 %v1165_v0  ;;  %1079 = vmatprep.subr.mxu1 %v1165_v0  ;;  %v29_v6 = vld [vmem:[%s1574_s0 + $0x8] sm:$0xff]  ;;  %v31_v7 = vld [vmem:[%s1575_s1] sm:$0xff]  ;;  %v1289_v21 = vshrl.u32 %v203_v20, 7  ;;  %v208_v23 = vand.u32 127, %v203_v20  ;;  %vm211_vm7 = vcmp.gt.f32.partialorder %v35_v30, 0.0 }
   0x4   :  { %1001 = vmatpush3.msra.mxu0 %v36_v2  ;;  %1081 = vmatpush3.msra.mxu1 %v36_v2  ;;  %v38_v8 = vld [vmem:[%s1576_s4] sm:$0x7]  ;;  %v34_v33 = vld [vmem:[%s1577_s2 + $0x8] sm:$0xff] }
   0x5   :  { %1002 = vmatprep.mubr.msk.f32.mxu0 %vm1166_vm1, %v1165_v0  ;;  %1008 = vmatprep.mubr.msk.f32.mxu1 %vm1166_vm1, %v1165_v0  ;;  %v235_v22 = vsub.s32 0, %v1289_v21  ;;  %v33_v25 = vld [vmem:[%s1577_s2] sm:$0xff]  ;;  %v384_v26 = vsub.s32 1, %v1289_v21  ;;  %vm212_vm3 = vcmp.eq.s32.totalorder %v1289_v21, %v208_v23  ;;  %v205_v29 = vadd.s32 8, %v1289_v21  ;;  %s1170_s2 = smov 112  }
   0x6   :  { %1003 = vmatmul.mubr.msk.f32.vlgmr.msra.gmra.mxu0 %vm40_vm0, %v28_v3  ;;  %1009 = vmatmul.mubr.msk.f32.vlgmr.msra.gmra.mxu1 %vm40_vm0, %v30_v4  ;;  %vm209_vm2 = vcmp.gt.f32.partialorder %v33_v25, 0.0  ;;  %v206_v34 = vadd.s32 16, %v1289_v21  ;;  %v391_v35 = vsub.s32 2, %v1289_v21  ;;  %vm210_vm8 = vcmp.gt.f32.partialorder %v34_v33, 0.0 }
   0x7   :  { %1005 = vmatprep.mubr.msk.f32.mxu0 %vm1166_vm1, %v1165_v0  ;;  %1011 = vmatprep.subr.mxu1 %v1165_v0  ;;  %vm1308_vm4 = vmor %vm209_vm2, %vm212_vm3  ;;  %vm213_vm9 = vcmp.eq.s32.totalorder %v205_v29, %v208_v23 }
   0x8   :  { %1012 = vmatpush3.msra.mxu1 %v32_v5  ;;  %1015 = vmatprep.mubr.msk.f32.mxu1 %vm1166_vm1, %v1165_v0  ;;  %vm214_vm10 = vcmp.eq.s32.totalorder %v206_v34, %v208_v23  ;;  %vm1320_vm12 = vmor %vm210_vm8, %vm213_vm9  ;;  %vm396_vm8 = vcmask 64512   ;;  %vm595_vm9 = vcmask 130112  }
   0x9   :  { %1013 = vmatprep.subr.mxu1 %v1165_v0  ;;  %1097 = vset.pattern.permute.xlu1 %v1167_v9  ;;  %vm1327_vm15 = vmor %vm211_vm7, %vm214_vm10  ;;  %vm893_vm7 = vcmask 7168   ;;  %vm791_vm10 = vcmask 195712  }
   0xa   :  { %1006 = vmatmul.mubr.msk.f32.gmra.mxu0 %vm40_vm0, %v29_v6  ;;  %1014 = vmatpush3.msra.mxu1 %v31_v7 }
   0xb   :  { %1016 = vmatmul.mubr.msk.f32.vlgmr.msra.gmra.mxu1 %vm40_vm0, %v38_v8  ;;  %1096 = vset.pattern.permute.xlu0 %v1167_v9 }
   0xc   :  { %1018 = vmatprep.subr.mxu1 %v1165_v0  ;;  %1033 = vmatprep.subr.mxu0 %v1165_v0 }
   0xd   :  { %1024 = vmatprep.mubr.msk.f32.mxu1 %vm1166_vm1, %v1165_v0  ;;  %1039 = vmatprep.mubr.msk.f32.mxu0 %vm1166_vm1, %v1165_v0 }
  0xc6   :  { %v1268_v10 = vpop.f32.mrf.mxu0  ;;  %v1270_v11 = vpop.f32.mrf.mxu1 }
  0xc7   :  { %230 = vperm.xlu1 %1097, %v1270_v11   ;;  %220 = vperm.xlu0 %1096, %v1268_v10  }
  0xc8   :  { %v1004_v12 = vpop.f32.mrf.mxu0  ;;  %v1010_v13 = vpop.f32.mrf.mxu1  ;;  %1019 = vmatpush3.msra.mxu1 %v1270_v11 }
  0xc9   :  { %1020 = vmatprep.subr.mxu1 %v1165_v0 }
  0xca   :  { %v1276_v14 = vpop.f32.mrf.mxu0 }
  0xcb   :  { %1098 = vset.pattern.permute.xlu1 %v1168_v15  ;;  %225 = vperm.xlu0 %1096, %v1276_v14   ;;  %v199_v16 = vpop.f32.mrf.mxu1 }
  0xcc   :  { %1021 = vmatpush3.msra.mxu1 %v1276_v14  ;;  %401 = vperm.xlu1 %1098, %v1268_v10   ;;  %v1007_v17 = vpop.f32.mrf.mxu0  ;;  %v236_v24 = vrot.slane %v199_v16, %v235_v22  ;;  %v415_v38 = vrot.slane %v199_v16, %v384_v26  ;;  %v614_v49 = vrot.slane %v199_v16, %v391_v35 }
  0xcd   :  { %1022 = vmatprep.subr.mxu1 %v1165_v0  ;;  %v1017_v18 = vpop.f32.mrf.mxu1 }
  0xce   :  { %1023 = vmatpush3.msra.mxu1 %v1268_v10 }
  0xcf   :  { %1099 = vset.pattern.permute.xlu0 %v1169_v19  ;;  %1048 = vmatprep.subr.mxu1 %v1165_v0 }
  0xd0   :  { %405 = vperm.xlu1 %1098, %v1276_v14   ;;  %600 = vperm.xlu0 %1099, %v1268_v10  }
  0xd4   :  { %1101 = vset.pattern.permute.xlu1 %v1169_v19  ;;  %1100 = vset.pattern.permute.xlu0 %v1168_v15 }
  0xd5   :  { %604 = vperm.xlu1 %1101, %v1276_v14   ;;  %409 = vperm.xlu0 %1100, %v1270_v11  }
  0xd9   :  { %608 = vperm.xlu1 %1101, %v1270_v11  }
 0x142   :  { %v231_v27 = vpop.permute.xlu1 %230  ;;  %v221_v28 = vpop.permute.xlu0 %220 }
 0x143   :  { %v239_v31 = vadd.f32 %v236_v24, %v231_v27  ;;  %v237_v32 = vadd.f32 %v236_v24, %v221_v28 }
 0x145   :  { %v243_v36 = vmul.f32 0.2, %v237_v32  ;;  %vm240_vm5 = vcmp.gt.f32.partialorder %v237_v32, 0.0  ;;  %v245_v39 = vmul.f32 0.2, %v239_v31  ;;  %vm242_vm11 = vcmp.gt.f32.partialorder %v239_v31, 0.0 }
 0x146   :  { %v226_v40 = vpop.permute.xlu0 %225 }
 0x147   :  { %v238_v41 = vadd.f32 %v236_v24, %v226_v40  ;;  %v402_v42 = vpop.permute.xlu1 %401  ;;  %v246_v43 = vsel %vm240_vm5, %v237_v32, %v243_v36  ;;  %v248_v52 = vsel %vm242_vm11, %v239_v31, %v245_v39 }
 0x148   :  { %v416_v44 = vadd.f32 %v415_v38, %v402_v42  ;;  %v1316_v45 = vsel %vm1308_vm4, %v246_v43, -1e+30  ;;  %v251_v62 = vsel %vm1327_vm15, %v248_v52, -1e+30 }
 0x149   :  { %v244_v46 = vmul.f32 0.2, %v238_v41  ;;  %v253_v47 = vsel %vm252_vm6, %v1316_v45, -inf  ;;  %vm241_vm13 = vcmp.gt.f32.partialorder %v238_v41, 0.0  ;;  %v259_v9 = vsel %vm252_vm6, %v251_v62, -inf }
 0x14a   :  { %v422_v50 = vmul.f32 0.2, %v416_v44  ;;  %254 = vmax.xlane.f32.xlu1 %v253_v47  ;;  %vm419_vm14 = vcmp.gt.f32.partialorder %v416_v44, 0.0 }
 0x14b   :  { %v406_v53 = vpop.permute.xlu1 %405  ;;  %v601_v54 = vpop.permute.xlu0 %600  ;;  %v247_v55 = vsel %vm241_vm13, %v238_v41, %v244_v46 }
 0x14c   :  { %v417_v56 = vadd.f32 %v415_v38, %v406_v53  ;;  %v615_v57 = vadd.f32 %v614_v49, %v601_v54  ;;  %v1333_v58 = vsel %vm1320_vm12, %v247_v55, -1e+30  ;;  %v425_v59 = vsel %vm419_vm14, %v416_v44, %v422_v50 }
 0x14d   :  { %v256_v60 = vsel %vm252_vm6, %v1333_v58, -inf  ;;  %v428_v61 = vsel %vm1308_vm4, %v425_v59, -1e+30 }
 0x14e   :  { %v423_v63 = vmul.f32 0.2, %v417_v56  ;;  %v621_v1 = vmul.f32 0.2, %v615_v57  ;;  %257 = vmax.xlane.f32.xlu0 %v256_v60  ;;  %v431_v2 = vsel %vm252_vm6, %v428_v61, -inf  ;;  %vm420_vm0 = vcmp.gt.f32.partialorder %v417_v56, 0.0 }
 0x14f   :  { %432 = vmax.xlane.f32.xlu1 %v431_v2  ;;  %vm618_vm2 = vcmp.gt.f32.partialorder %v615_v57, 0.0 }
 0x150   :  { %v605_v3 = vpop.permute.xlu1 %604  ;;  %v410_v4 = vpop.permute.xlu0 %409  ;;  %v426_v5 = vsel %vm420_vm0, %v417_v56, %v423_v63  ;;  %v624_v6 = vsel %vm618_vm2, %v615_v57, %v621_v1 }
 0x151   :  { %v616_v7 = vadd.f32 %v614_v49, %v605_v3  ;;  %v418_v8 = vadd.f32 %v415_v38, %v410_v4  ;;  %v429_v12 = vsel %vm1320_vm12, %v426_v5, -1e+30  ;;  %v627_v15 = vsel %vm1308_vm4, %v624_v6, -1e+30 }
 0x152   :  { %260 = vmax.xlane.f32.xlu0 %v259_v9  ;;  %v434_v13 = vsel %vm252_vm6, %v429_v12, -inf  ;;  %v630_v20 = vsel %vm252_vm6, %v627_v15, -inf }
 0x153   :  { %v622_v16 = vmul.f32 0.2, %v616_v7  ;;  %v424_v17 = vmul.f32 0.2, %v418_v8  ;;  %435 = vmax.xlane.f32.xlu1 %v434_v13  ;;  %vm421_vm3 = vcmp.gt.f32.partialorder %v418_v8, 0.0  ;;  %vm619_vm5 = vcmp.gt.f32.partialorder %v616_v7, 0.0 }
 0x154   :  { %v609_v18 = vpop.permute.xlu1 %608 }
 0x155   :  { %v617_v19 = vadd.f32 %v614_v49, %v609_v18  ;;  %v427_v23 = vsel %vm421_vm3, %v418_v8, %v424_v17  ;;  %v625_v24 = vsel %vm619_vm5, %v616_v7, %v622_v16 }
 0x156   :  { %631 = vmax.xlane.f32.xlu0 %v630_v20  ;;  %v430_v25 = vsel %vm1327_vm15, %v427_v23, -1e+30  ;;  %v628_v27 = vsel %vm1320_vm12, %v625_v24, -1e+30  ;;  %v39_v23 = vld [vmem:[%s1578_s5] sm:$0x7] }
 0x157   :  { %v623_v28 = vmul.f32 0.2, %v617_v19  ;;  %v437_v29 = vsel %vm252_vm6, %v430_v25, -inf  ;;  %vm620_vm4 = vcmp.gt.f32.partialorder %v617_v19, 0.0  ;;  %v633_v30 = vsel %vm252_vm6, %v628_v27, -inf }
 0x158   :  { %438 = vmax.xlane.f32.xlu1 %v437_v29  ;;  %v1413_v24 = vrot.slane %v39_v23, %v235_v22  ;;  %v1429_v22 = vrot.slane %v39_v23, %v391_v35 }
 0x159   :  { %v626_v31 = vsel %vm620_vm4, %v617_v19, %v623_v28 }
 0x15a   :  { %634 = vmax.xlane.f32.xlu0 %v633_v30  ;;  %v629_v32 = vsel %vm1327_vm15, %v626_v31, -1e+30 }
 0x15b   :  { %v636_v33 = vsel %vm252_vm6, %v629_v32, -inf }
 0x15e   :  { %637 = vmax.xlane.f32.xlu0 %v636_v33 }
 0x169   :  { %667 = vrot.lane.b32.xlu1 %v1270_v11, %s1170_s2 }
 0x16d   :  { %466 = vrot.lane.b32.xlu1 %v1276_v14, %s1171_s23 }
 0x174   :  { %468 = vrot.lane.b32.xlu0 %v1270_v11, %s1171_s23 }
 0x178   :  { %665 = vrot.lane.b32.xlu0 %v1276_v14, %s1170_s2 }
 0x1d3   :  { %v255_v34 = vpop.xlane.xlu1 %254 }
 0x1d4   :  { %v262_v36 = vsub.f32 %v1316_v45, %v255_v34 }
 0x1d6   :  { %v265_v37 = vmul.f32 1.442695, %v262_v36 }
 0x1d7   :  { %v258_v38 = vpop.xlane.xlu0 %257 }
 0x1d8   :  { %1103 = vpow2.f32 %v265_v37  ;;  %v433_v39 = vpop.xlane.xlu1 %432  ;;  %v263_v11 = vsub.f32 %v1333_v58, %v258_v38 }
 0x1d9   :  { %v440_v40 = vsub.f32 %v428_v61, %v433_v39 }
 0x1da   :  { %v267_v52 = vmul.f32 1.442695, %v263_v11 }
 0x1db   :  { %v443_v41 = vmul.f32 1.442695, %v440_v40  ;;  %v261_v42 = vpop.xlane.xlu0 %260 }
 0x1dc   :  { %v264_v43 = vsub.f32 %v251_v62, %v261_v42  ;;  %v436_v44 = vpop.xlane.xlu1 %435 }
 0x1dd   :  { %1105 = vpow2.f32 %v443_v41  ;;  %v441_v45 = vsub.f32 %v429_v12, %v436_v44 }
 0x1de   :  { %v269_v46 = vmul.f32 1.442695, %v264_v43 }
 0x1df   :  { %v632_v47 = vpop.xlane.xlu0 %631  ;;  %v445_v57 = vmul.f32 1.442695, %v441_v45 }
 0x1e0   :  { %1107 = vpow2.f32 %v269_v46  ;;  %v639_v48 = vsub.f32 %v627_v15, %v632_v47 }
 0x1e1   :  { %v439_v14 = vpop.xlane.xlu1 %438 }
 0x1e2   :  { %v642_v49 = vmul.f32 1.442695, %v639_v48  ;;  %v442_v50 = vsub.f32 %v430_v25, %v439_v14  ;;  %v1421_v25 = vrot.slane %v39_v23, %v384_v26 }
 0x1e3   :  { %v635_v51 = vpop.xlane.xlu0 %634 }
 0x1e4   :  { %1109 = vpow2.f32 %v642_v49  ;;  %v447_v53 = vmul.f32 1.442695, %v442_v50  ;;  %v640_v55 = vsub.f32 %v628_v27, %v635_v51 }
 0x1e5   :  { %v1368_v54 = vpop.eup %1103  ;;  %v1372_v59 = vpop.permute.xlu1 %667 }
 0x1e6   :  { %1111 = vpow2.f32 %v447_v53  ;;  %v271_v56 = vsel %vm252_vm6, %v1368_v54, 0.0  ;;  %v644_v62 = vmul.f32 1.442695, %v640_v55  ;;  %v799_v53 = vld [vmem:[%s1579_s6 + $0x8] sm:$0xff] }
 0x1e7   :  { %272 = vadd.xlane.f32.xlu1 %v271_v56  ;;  %v638_v58 = vpop.xlane.xlu0 %637  ;;  %1113 = vpow2.f32 %v267_v52  ;;  %v798_v52 = vld [vmem:[%s1579_s6] sm:$0xff]  ;;  %v891_v56 = vmul.f32 %v799_v53, %v799_v53 }
 0x1e8   :  { %v641_v60 = vsub.f32 %v629_v32, %v638_v58  ;;  %1115 = vpow2.f32 %v445_v57  ;;  %v890_v55 = vmul.f32 %v798_v52, %v798_v52 }
 0x1e9   :  { %v467_v4 = vpop.permute.xlu1 %466  ;;  %v895_v58 = vsel %vm893_vm7, %v891_v56, 0.0 }
 0x1ea   :  { %v1374_v61 = vpop.eup %1105  ;;  %v646_v63 = vmul.f32 1.442695, %v641_v60 }
 0x1eb   :  { %v469_v1 = vpop.permute.xlu0 %468  ;;  %v449_v2 = vsel %vm252_vm6, %v1374_v61, 0.0 }
 0x1ec   :  { %1117 = vpow2.f32 %v646_v63  ;;  %450 = vadd.xlane.f32.xlu0 %v449_v2  ;;  %1034 = vmatpush3.msra.mxu0 %v469_v1 }
 0x1ed   :  { %v1378_v3 = vpop.eup %1107  ;;  %1035 = vmatprep.subr.mxu0 %v1165_v0  ;;  %1119 = vpow2.f32 %v644_v62 }
 0x1ee   :  { %1036 = vmatpush3.msra.mxu0 %v467_v4  ;;  %v277_v5 = vsel %vm252_vm6, %v1378_v3, 0.0 }
 0x1ef   :  { %278 = vadd.xlane.f32.xlu1 %v277_v5  ;;  %1037 = vmatprep.subr.mxu0 %v1165_v0  ;;  %v666_v26 = vpop.permute.xlu0 %665 }
 0x1f1   :  { %v1384_v6 = vpop.eup %1109 }
 0x1f2   :  { %v648_v7 = vsel %vm252_vm6, %v1384_v6, 0.0 }
 0x1f3   :  { %v1388_v8 = vpop.eup %1111  ;;  %649 = vadd.xlane.f32.xlu1 %v648_v7 }
 0x1f4   :  { %v455_v9 = vsel %vm252_vm6, %v1388_v8, 0.0  ;;  %v1392_v12 = vpop.eup %1113 }
 0x1f5   :  { %456 = vadd.xlane.f32.xlu0 %v455_v9  ;;  %v1394_v13 = vpop.eup %1115  ;;  %v274_v15 = vsel %vm252_vm6, %v1392_v12, 0.0 }
 0x1f6   :  { %v452_v19 = vsel %vm252_vm6, %v1394_v13, 0.0 }
 0x1f9   :  { %v1398_v16 = vpop.eup %1117  ;;  %275 = vadd.xlane.f32.xlu0 %v274_v15 }
 0x1fa   :  { %v654_v17 = vsel %vm252_vm6, %v1398_v16, 0.0  ;;  %v1402_v18 = vpop.eup %1119 }
 0x1fb   :  { %655 = vadd.xlane.f32.xlu1 %v654_v17  ;;  %v651_v20 = vsel %vm252_vm6, %v1402_v18, 0.0 }
 0x1fd   :  { %453 = vadd.xlane.f32.xlu0 %v452_v19 }
 0x1ff   :  { %652 = vadd.xlane.f32.xlu1 %v651_v20 }
 0x210   :  { %464 = vrot.lane.b32.xlu1 %v1268_v10, %s1171_s23 }
 0x213   :  { %663 = vrot.lane.b32.xlu0 %v1268_v10, %s1170_s2 }
 0x214   :  { %474 = vrot.lane.b32.xlu1 %v1413_v24, %s1171_s23 }
 0x217   :  { %672 = vrot.lane.b32.xlu0 %v1413_v24, %s1170_s2 }
 0x218   :  { %570 = vrot.lane.b32.xlu1 %v1421_v25, %s1171_s23 }
 0x21b   :  { %767 = vrot.lane.b32.xlu0 %v1421_v25, %s1170_s2 }
 0x21c   :  { %577 = vrot.lane.b32.xlu1 %v1429_v22, %s1171_s23 }
 0x21f   :  { %773 = vrot.lane.b32.xlu0 %v1429_v22, %s1170_s2 }
 0x270   :  { %v273_v10 = vpop.xlane.xlu1 %272 }
 0x271   :  { %1121 = vrcp.f32 %v273_v10 }
 0x275   :  { %v451_v27 = vpop.xlane.xlu0 %450 }
 0x276   :  { %1123 = vrcp.f32 %v451_v27 }
 0x278   :  { %v279_v28 = vpop.xlane.xlu1 %278 }
 0x27c   :  { %v650_v30 = vpop.xlane.xlu1 %649 }
 0x27e   :  { %v1122_v21 = vpop.eup %1121  ;;  %v457_v35 = vpop.xlane.xlu0 %456 }
 0x27f   :  { %v283_v29 = vmul.f32 %v1122_v21, %v1368_v54  ;;  %v800_v54 = vld [vmem:[%s1579_s6 + $0x10] sm:$0xff] }
 0x280   :  { %v892_v57 = vmul.f32 %v800_v54, %v800_v54 }
 0x281   :  { %1025 = vmatmul.mubr.msk.f32.vlgmr.msra.gmra.mxu1 %vm252_vm6, %v283_v29 }
 0x282   :  { %1049 = vmatpush3.msra.mxu1 %v1372_v59  ;;  %v276_v31 = vpop.xlane.xlu0 %275  ;;  %1027 = vmatprep.mubr.msk.f32.mxu1 %vm1166_vm1, %v1165_v0  ;;  %v894_v59 = vsel %vm893_vm7, %v890_v55, 0.0  ;;  %v897_v60 = vsel %vm893_vm7, %v892_v57, 0.0 }
 0x283   :  { %1125 = vrcp.f32 %v276_v31  ;;  %1050 = vmatprep.subr.mxu1 %v1165_v0  ;;  %v1124_v36 = vpop.eup %1123 }
 0x284   :  { %1051 = vmatpush3.msra.mxu1 %v666_v26  ;;  %v656_v32 = vpop.xlane.xlu1 %655  ;;  %1127 = vrcp.f32 %v279_v28  ;;  %v461_v38 = vmul.f32 %v1124_v36, %v1374_v61  ;;  %v896_v61 = vadd.f32 %v895_v58, %v894_v59 }
 0x285   :  { %1052 = vmatprep.subr.mxu1 %v1165_v0 }
 0x286   :  { %v454_v33 = vpop.xlane.xlu0 %453  ;;  %v1491_v62 = vadd.f32 %v897_v60, %v896_v61 }
 0x287   :  { %1129 = vrcp.f32 %v454_v33 }
 0x288   :  { %1131 = vrcp.f32 %v650_v30  ;;  %v653_v34 = vpop.xlane.xlu1 %652 }
 0x289   :  { %1133 = vrcp.f32 %v457_v35 }
 0x28a   :  { %v664_v37 = vpop.permute.xlu0 %663  ;;  %1135 = vrcp.f32 %v653_v34 }
 0x28b   :  { %1053 = vmatpush3.msra.mxu1 %v664_v37  ;;  %1137 = vrcp.f32 %v656_v32 }
 0x28c   :  { %v465_v39 = vpop.permute.xlu1 %464 }
 0x28d   :  { %1038 = vmatpush3.msra.mxu0 %v465_v39 }
 0x28e   :  { %1040 = vmatmul.mubr.msk.f32.vlgmr.msra.gmra.mxu0 %vm252_vm6, %v461_v38  ;;  %1063 = vmatprep.subr.mxu0 %v1165_v0  ;;  %v673_v20 = vpop.permute.xlu0 %672 }
 0x28f   :  { %1042 = vmatprep.mubr.msk.f32.mxu0 %vm1166_vm1, %v1165_v0  ;;  %1064 = vmatpush3.msra.mxu0 %v800_v54 }
 0x290   :  { %v1126_v40 = vpop.eup %1125  ;;  %1065 = vmatprep.subr.mxu0 %v1165_v0 }
 0x291   :  { %v284_v41 = vmul.f32 %v1126_v40, %v1392_v12  ;;  %v1128_v42 = vpop.eup %1127  ;;  %1066 = vmatpush3.msra.mxu0 %v799_v53 }
 0x292   :  { %v285_v46 = vmul.f32 %v1128_v42, %v1378_v3  ;;  %1067 = vmatprep.subr.mxu0 %v1165_v0  ;;  %v475_v3 = vpop.permute.xlu1 %474 }
 0x293   :  { %1028 = vmatmul.mubr.msk.f32.gmra.mxu1 %vm252_vm6, %v284_v41  ;;  %1068 = vmatpush3.msra.mxu0 %v798_v52 }
 0x294   :  { %v1130_v43 = vpop.eup %1129  ;;  %1030 = vmatprep.mubr.msk.f32.mxu1 %vm1166_vm1, %v1165_v0 }
 0x295   :  { %v1132_v44 = vpop.eup %1131  ;;  %v462_v47 = vmul.f32 %v1130_v43, %v1394_v13  ;;  %v768_v43 = vpop.permute.xlu0 %767 }
 0x296   :  { %v1134_v11 = vpop.eup %1133  ;;  %v660_v48 = vmul.f32 %v1132_v44, %v1384_v6  ;;  %v571_v23 = vpop.permute.xlu1 %570 }
 0x297   :  { %1031 = vmatmul.mubr.msk.f32.gmra.mxu1 %vm252_vm6, %v285_v46  ;;  %1043 = vmatmul.mubr.msk.f32.gmra.mxu0 %vm252_vm6, %v462_v47  ;;  %v463_v14 = vmul.f32 %v1134_v11, %v1388_v8  ;;  %v1136_v49 = vpop.eup %1135 }
 0x298   :  { %1045 = vmatprep.mubr.msk.f32.mxu0 %vm1166_vm1, %v1165_v0  ;;  %1054 = vmatprep.mubr.msk.f32.mxu1 %vm1166_vm1, %v1165_v0  ;;  %v661_v50 = vmul.f32 %v1136_v49, %v1402_v18  ;;  %v1138_v45 = vpop.eup %1137 }
 0x299   :  { %v662_v51 = vmul.f32 %v1138_v45, %v1398_v16  ;;  %v774_v52 = vpop.permute.xlu0 %773 }
 0x29a   :  { %v578_v32 = vpop.permute.xlu1 %577 }
 0x29b   :  { %1046 = vmatmul.mubr.msk.f32.gmra.mxu0 %vm252_vm6, %v463_v14  ;;  %1055 = vmatmul.mubr.msk.f32.vlgmr.msra.gmra.mxu1 %vm252_vm6, %v660_v48 }
 0x29c   :  { %1057 = vmatprep.mubr.msk.f32.mxu1 %vm1166_vm1, %v1165_v0  ;;  %1069 = vmatprep.mubr.msk.f32.mxu0 %vm1166_vm1, %v1165_v0 }
 0x29f   :  { %1058 = vmatmul.mubr.msk.f32.gmra.mxu1 %vm252_vm6, %v661_v50 }
 0x2a0   :  { %1060 = vmatprep.mubr.msk.f32.mxu1 %vm1166_vm1, %v1165_v0 }
 0x2a3   :  { %1061 = vmatmul.mubr.msk.f32.gmra.mxu1 %vm252_vm6, %v662_v51 }
 0x341   :  { %v365_v63 = vpop.f32.mrf.mxu1 }
 0x342   :  { %v366_v1 = vadd.f32 %v365_v63, %v1413_v24 }
 0x343   :  { %v1026_v2 = vpop.f32.mrf.mxu1 }
 0x344   :  { %1139 = vtanh.f32 %v366_v1 }
 0x34e   :  { %v552_v4 = vpop.f32.mrf.mxu0 }
 0x34f   :  { %v553_v5 = vadd.f32 %v552_v4, %v475_v3 }
 0x350   :  { %v1041_v6 = vpop.f32.mrf.mxu0 }
 0x351   :  { %v1140_v7 = vpop.eup %1139  ;;  %1141 = vtanh.f32 %v553_v5 }
 0x352   :  { %v386_v8 = vmul.f32 %v1140_v7, %v1421_v25 }
 0x353   :  { %v370_v9 = vpop.f32.mrf.mxu1 }
 0x354   :  { %v371_v12 = vadd.f32 %v370_v9, %v1413_v24  ;;  %v393_v13 = vadd.f32 %v1429_v22, %v386_v8 }
 0x355   :  { %v1029_v15 = vpop.f32.mrf.mxu1 }
 0x356   :  { %1143 = vtanh.f32 %v371_v12  ;;  %397 = vst.msk [vmem:[%s1580_s7] sm:$0xff] %vm396_vm8, %v393_v13 }
 0x357   :  { %v375_v16 = vpop.f32.mrf.mxu1  ;;  %v557_v17 = vpop.f32.mrf.mxu0 }
 0x358   :  { %v376_v18 = vadd.f32 %v375_v16, %v1413_v24  ;;  %v558_v19 = vadd.f32 %v557_v17, %v475_v3  ;;  %v1174_v16 = vmov 0  }
 0x359   :  { %v1032_v10 = vpop.f32.mrf.mxu1  ;;  %v1044_v26 = vpop.f32.mrf.mxu0  ;;  %1102 = vset.pattern.permute.xlu0 %v1174_v16 }
 0x35a   :  { %1145 = vtanh.f32 %v376_v18 }
 0x35b   :  { %1147 = vtanh.f32 %v558_v19  ;;  %v562_v27 = vpop.f32.mrf.mxu0  ;;  %v750_v28 = vpop.f32.mrf.mxu1 }
 0x35c   :  { %v563_v21 = vadd.f32 %v562_v27, %v475_v3  ;;  %v751_v35 = vadd.f32 %v750_v28, %v673_v20 }
 0x35d   :  { %v1047_v29 = vpop.f32.mrf.mxu0  ;;  %v1056_v30 = vpop.f32.mrf.mxu1 }
 0x35e   :  { %v1142_v31 = vpop.eup %1141  ;;  %1149 = vtanh.f32 %v563_v21 }
 0x35f   :  { %1151 = vtanh.f32 %v751_v35  ;;  %v573_v33 = vmul.f32 %v1142_v31, %v571_v23  ;;  %v755_v34 = vpop.f32.mrf.mxu1 }
 0x360   :  { %v756_v24 = vadd.f32 %v755_v34, %v673_v20 }
 0x361   :  { %v580_v36 = vadd.f32 %v578_v32, %v573_v33  ;;  %v1059_v37 = vpop.f32.mrf.mxu1 }
 0x362   :  { %1153 = vtanh.f32 %v756_v24 }
 0x363   :  { %v1144_v38 = vpop.eup %1143  ;;  %v760_v39 = vpop.f32.mrf.mxu1  ;;  %586 = vrot.lane.b32.xlu1 %v580_v36, %s1172_s10 }
 0x364   :  { %v761_v40 = vadd.f32 %v760_v39, %v673_v20  ;;  %v387_v41 = vmul.f32 %v1144_v38, %v1421_v25 }
 0x365   :  { %v1062_v42 = vpop.f32.mrf.mxu1 }
 0x366   :  { %1155 = vtanh.f32 %v761_v40  ;;  %v394_v44 = vadd.f32 %v1429_v22, %v387_v41 }
 0x367   :  { %v1146_v46 = vpop.eup %1145 }
 0x368   :  { %v1148_v47 = vpop.eup %1147  ;;  %398 = vst.msk [vmem:[%s1580_s7 + $0x8] sm:$0xff] %vm396_vm8, %v394_v44  ;;  %v388_v11 = vmul.f32 %v1146_v46, %v1421_v25 }
 0x369   :  { %v574_v48 = vmul.f32 %v1148_v47, %v571_v23 }
 0x36a   :  { %v395_v14 = vadd.f32 %v1429_v22, %v388_v11 }
 0x36b   :  { %v1150_v49 = vpop.eup %1149  ;;  %v581_v50 = vadd.f32 %v578_v32, %v574_v48 }
 0x36c   :  { %v1152_v45 = vpop.eup %1151  ;;  %v575_v51 = vmul.f32 %v1150_v49, %v571_v23  ;;  %399 = vst.msk [vmem:[%s1580_s7 + $0x10] sm:$0xff] %vm396_vm8, %v395_v14 }
 0x36d   :  { %v770_v53 = vmul.f32 %v1152_v45, %v768_v43  ;;  %588 = vrot.lane.b32.xlu1 %v581_v50, %s1172_s10 }
 0x36e   :  { %v582_v54 = vadd.f32 %v578_v32, %v575_v51 }
 0x36f   :  { %v1154_v55 = vpop.eup %1153  ;;  %v776_v56 = vadd.f32 %v774_v52, %v770_v53 }
 0x370   :  { %v771_v57 = vmul.f32 %v1154_v55, %v768_v43 }
 0x371   :  { %782 = vrot.lane.b32.xlu0 %v776_v56, %s1173_s14  ;;  %590 = vrot.lane.b32.xlu1 %v582_v54, %s1172_s10 }
 0x372   :  { %v777_v25 = vadd.f32 %v774_v52, %v771_v57 }
 0x373   :  { %v1156_v22 = vpop.eup %1155 }
 0x374   :  { %v772_v59 = vmul.f32 %v1156_v22, %v768_v43 }
 0x375   :  { %784 = vrot.lane.b32.xlu0 %v777_v25, %s1173_s14 }
 0x376   :  { %v778_v58 = vadd.f32 %v774_v52, %v772_v59 }
 0x379   :  { %786 = vrot.lane.b32.xlu0 %v778_v58, %s1173_s14 }
 0x395   :  { %899 = vadd.xlane.f32.xlu1 %v1491_v62 }
 0x3d5   :  { %v587_v60 = vpop.permute.xlu1 %586 }
 0x3d6   :  { %596 = vst.msk [vmem:[%s1580_s7] sm:$0xff] %vm595_vm9, %v587_v60 }
 0x3df   :  { %v589_v61 = vpop.permute.xlu1 %588 }
 0x3e0   :  { %597 = vst.msk [vmem:[%s1580_s7 + $0x8] sm:$0xff] %vm595_vm9, %v589_v61 }
 0x3e3   :  { %v783_v63 = vpop.permute.xlu0 %782  ;;  %v591_v1 = vpop.permute.xlu1 %590 }
 0x3e4   :  { %792 = vst.msk [vmem:[%s1580_s7] sm:$0xff] %vm791_vm10, %v783_v63 }
 0x3e5   :  { %598 = vst.msk [vmem:[%s1580_s7 + $0x10] sm:$0xff] %vm595_vm9, %v591_v1 }
 0x3e7   :  { %v785_v62 = vpop.permute.xlu0 %784 }
 0x3e8   :  { %793 = vst.msk [vmem:[%s1580_s7 + $0x8] sm:$0xff] %vm791_vm10, %v785_v62 }
 0x3eb   :  { %v787_v2 = vpop.permute.xlu0 %786  ;;  %v795_v3 = vld [vmem:[%s1580_s7] sm:$0xff] }
 0x3ec   :  { %794 = vst.msk [vmem:[%s1580_s7 + $0x10] sm:$0xff] %vm791_vm10, %v787_v2  ;;  %1070 = vmatmul.mubr.msk.f32.vlgmr.msra.gmra.mxu0 %vm252_vm6, %v795_v3 }
 0x3ed   :  { %1072 = vmatprep.mubr.msk.f32.mxu0 %vm1166_vm1, %v1165_v0 }
 0x3ef   :  { %v796_v4 = vld [vmem:[%s1580_s7 + $0x8] sm:$0xff] }
 0x3f0   :  { %1073 = vmatmul.mubr.msk.f32.gmra.mxu0 %vm252_vm6, %v796_v4 }
 0x3f1   :  { %1075 = vmatprep.mubr.msk.f32.mxu0 %vm1166_vm1, %v1165_v0 }
 0x3f3   :  { %v797_v5 = vld [vmem:[%s1580_s7 + $0x10] sm:$0xff] }
 0x3f4   :  { %1076 = vmatmul.mubr.msk.f32.gmra.mxu0 %vm252_vm6, %v797_v5 }
 0x41e   :  { %v900_v6 = vpop.xlane.xlu1 %899 }
 0x41f   :  { %v901_v7 = vrot.slane %v900_v6, 4 }
 0x421   :  { %v902_v8 = vadd.f32 %v901_v7, %v900_v6 }
 0x423   :  { %v903_v9 = vrot.slane %v902_v8, 2 }
 0x425   :  { %v904_v12 = vadd.f32 %v903_v9, %v902_v8 }
 0x427   :  { %v905_v13 = vrot.slane %v904_v12, 1 }
 0x429   :  { %v906_v15 = vadd.f32 %v905_v13, %v904_v12 }
 0x42b   :  { %1082 = vpush %v906_v15 }
 0x45c   :  { %s1083_s28 = spop %1082 }
 0x45d   :  { %v908_v17 = vstv %s1083_s28 }
 0x45e   :  { %1157 = vrsqrt.f32 %v908_v17 }
 0x46b   :  { %v1158_v0 = vpop.eup %1157 }
 0x46c   :  { %1084 = vpush %v1158_v0 }
 0x49d   :  { %s1085_s29 = spop %1084 }
 0x49e   :  { %v911_v18 = vstv %s1085_s29 }
 0x4ac   :  { %v876_v19 = vpop.f32.mrf.mxu0 }
 0x4ad   :  { %v912_v20 = vmul.f32 %v911_v18, %v876_v19 }
 0x4ae   :  { %v1071_v23 = vpop.f32.mrf.mxu0 }
 0x4af   :  { %1159 = vtanh.f32 %v912_v20 }
 0x4b0   :  { %v881_v10 = vpop.f32.mrf.mxu0 }
 0x4b1   :  { %v913_v26 = vmul.f32 %v911_v18, %v881_v10 }
 0x4b2   :  { %v1074_v27 = vpop.f32.mrf.mxu0 }
 0x4b3   :  { %1161 = vtanh.f32 %v913_v26 }
 0x4b4   :  { %v886_v28 = vpop.f32.mrf.mxu0 }
 0x4b5   :  { %v914_v21 = vmul.f32 %v911_v18, %v886_v28 }
 0x4b6   :  { %v1077_v35 = vpop.f32.mrf.mxu0 }
 0x4b7   :  { %1163 = vtanh.f32 %v914_v21 }
 0x4bc   :  { %v1160_v29 = vpop.eup %1159 }
 0x4bd   :  { %918 = vst.msk [vmem:[%s1581_s8] sm:$0xff] %vm893_vm7, %v1160_v29  ;;  %923 = vperm.xlu0 %1102, %v1160_v29  }
 0x4c0   :  { %v1162_v30 = vpop.eup %1161 }
 0x4c1   :  { %919 = vst.msk [vmem:[%s1581_s8 + $0x8] sm:$0xff] %vm893_vm7, %v1162_v30  ;;  %928 = vperm.xlu0 %1102, %v1162_v30  }
 0x4c4   :  { %v1164_v31 = vpop.eup %1163 }
 0x4c5   :  { %920 = vst.msk [vmem:[%s1581_s8 + $0x10] sm:$0xff] %vm893_vm7, %v1164_v31  ;;  %933 = vperm.xlu0 %1102, %v1164_v31  }
 0x538   :  { %v924_v32 = vpop.permute.xlu0 %923 }
 0x539   :  { %v936_v33 = vmul.f32 %v924_v32, %v795_v3 }
 0x53b   :  { %939 = vst.msk [vmem:[%s1580_s7] sm:$0xff] %vm252_vm6, %v936_v33 }
 0x53c   :  { %v929_v34 = vpop.permute.xlu0 %928 }
 0x53d   :  { %v937_v24 = vmul.f32 %v929_v34, %v796_v4 }
 0x53f   :  { %940 = vst.msk [vmem:[%s1580_s7 + $0x8] sm:$0xff] %vm252_vm6, %v937_v24 }
 0x540   :  { %v934_v36 = vpop.permute.xlu0 %933 }
 0x541   :  { %v938_v37 = vmul.f32 %v934_v36, %v797_v5 }
 0x543   :  { %941 = vst.msk [vmem:[%s1580_s7 + $0x10] sm:$0xff] %vm252_vm6, %v938_v37 }

// kernel: forward_probs.6
= control target key start
LH: loop header
LB: loop body
LE: loop exit
PB: predicated region body
PF: predicated region fallthrough
CT: control target
= control target key end

     0   :  { %v680_v0 = vmov 0.0   ;;  %vm681_vm0 = vmmov 0   ;;  %vm48_vm1 = vcmask 195584   ;;  %v682_v12 = vmov 8   ;;  %s877_s3 = inlined_call_operand.vmem [shape: f32[24,9], index: 3, kind: input, shape index: {}]   ;;  %s878_s0 = inlined_call_operand.vmem [shape: f32[20,24], index: 0, kind: input, shape index: {}]   ;;  %s879_s1 = inlined_call_operand.vmem [shape: f32[24,20], index: 1, kind: input, shape index: {}]   ;;  %s880_s4 = inlined_call_operand.vmem [shape: f32[1,24], index: 4, kind: input, shape index: {}]   ;;  %s881_s2 = inlined_call_operand.vmem [shape: f32[20,20], index: 2, kind: input, shape index: {}]   ;;  %s882_s6 = inlined_call_operand.vmem [shape: f32[8,1], index: 6, kind: input, shape index: {}]   ;;  %s883_s5 = inlined_call_operand.vmem [shape: f32[3,8], index: 5, kind: input, shape index: {}]   ;;  %s884_s7 = inlined_call_operand.vmem [shape: f32[20,8], index: 7, kind: output, shape index: {0}]   ;;  %s885_s8 = inlined_call_operand.vmem [shape: f32[20,1], index: 8, kind: output, shape index: {1}]  }
   0x1   :  { %592 = vmatprep.subr.mxu0 %v680_v0  ;;  %v39_v1 = vld [vmem:[%s877_s3 + $0x10] sm:$0xff]  ;;  %v38_v2 = vld [vmem:[%s877_s3 + $0x8] sm:$0xff]  ;;  %598 = vmatprep.mubr.msk.f32.mxu0 %vm681_vm0, %v680_v0  ;;  %v37_v3 = vld [vmem:[%s877_s3] sm:$0xff]  ;;  %vm308_vm2 = vcmask 1043456   ;;  %v211_v26 = vlaneseq  ;;  %vm260_vm7 = vcmask 162816  }
   0x2   :  { %593 = vmatpush3.msra.mxu0 %v39_v1  ;;  %v28_v4 = vld [vmem:[%s878_s0] sm:$0xff]  ;;  %607 = vmatprep.subr.mxu1 %v680_v0  ;;  %v33_v6 = vld [vmem:[%s879_s1 + $0x10] sm:$0xff]  ;;  %v32_v7 = vld [vmem:[%s879_s1 + $0x8] sm:$0xff] }
   0x3   :  { %594 = vmatprep.subr.mxu0 %v680_v0  ;;  %v42_v5 = vmax.f32 %v28_v4, 0.0  ;;  %v31_v8 = vld [vmem:[%s879_s1] sm:$0xff]  ;;  %613 = vmatprep.mubr.msk.f32.mxu1 %vm681_vm0, %v680_v0  ;;  %v29_v9 = vld [vmem:[%s878_s0 + $0x8] sm:$0xff]  ;;  %v47_v10 = vmax.f32 %v33_v6, 0.0  ;;  %v46_v11 = vmax.f32 %v32_v7, 0.0  ;;  %v785_v27 = vshrl.u32 %v211_v26, 7 }
   0x4   :  { %595 = vmatpush3.msra.mxu0 %v38_v2  ;;  %650 = vset.pattern.permute.xlu0 %v682_v12  ;;  %v45_v13 = vmax.f32 %v31_v8, 0.0  ;;  %v43_v14 = vmax.f32 %v29_v9, 0.0  ;;  %v30_v15 = vld [vmem:[%s878_s0 + $0x10] sm:$0xf]  ;;  %v40_v16 = vld [vmem:[%s880_s4] sm:$0x1] }
   0x5   :  { %596 = vmatprep.subr.mxu0 %v680_v0  ;;  %651 = vset.pattern.permute.xlu1 %v682_v12  ;;  %v44_v17 = vmax.f32 %v30_v15, 0.0  ;;  %v243_v28 = vsub.s32 0, %v785_v27  ;;  %v216_v29 = vand.u32 127, %v211_v26  ;;  %v34_v31 = vld [vmem:[%s881_s2] sm:$0xff]  ;;  %v213_v33 = vadd.s32 8, %v785_v27  ;;  %v35_v35 = vld [vmem:[%s881_s2 + $0x8] sm:$0xff] }
   0x6   :  { %597 = vmatpush3.msra.mxu0 %v37_v3  ;;  %608 = vmatpush3.msra.mxu1 %v47_v10  ;;  %vm217_vm3 = vcmp.gt.f32.partialorder %v34_v31, 0.0  ;;  %vm218_vm8 = vcmp.gt.f32.partialorder %v35_v35, 0.0  ;;  %v214_v38 = vadd.s32 16, %v785_v27  ;;  %v36_v41 = vld [vmem:[%s881_s2 + $0x10] sm:$0xf]  ;;  %v416_v6 = vld [vmem:[%s882_s6] sm:$0xff] }
   0x7   :  { %599 = vmatmul.mubr.msk.f32.vlgmr.msra.gmra.mxu0 %vm48_vm1, %v42_v5  ;;  %609 = vmatprep.subr.mxu1 %v680_v0  ;;  %vm220_vm4 = vcmp.eq.s32.totalorder %v785_v27, %v216_v29  ;;  %vm221_vm9 = vcmp.eq.s32.totalorder %v213_v33, %v216_v29  ;;  %vm219_vm12 = vcmp.gt.f32.partialorder %v36_v41, 0.0  ;;  %v506_v7 = vmul.f32 %v416_v6, %v416_v6 }
   0x8   :  { %601 = vmatprep.mubr.msk.f32.mxu0 %vm681_vm0, %v680_v0  ;;  %610 = vmatpush3.msra.mxu1 %v46_v11  ;;  %vm223_vm5 = vmor %vm217_vm3, %vm220_vm4  ;;  %vm222_vm13 = vcmp.eq.s32.totalorder %v214_v38, %v216_v29  ;;  %v41_v29 = vld [vmem:[%s883_s5] sm:$0x7]  ;;  %v396_v38 = vsub.s32 1, %v785_v27  ;;  %v403_v41 = vsub.s32 2, %v785_v27  ;;  %vm408_vm3 = vcmask 64512  }
   0x9   :  { %611 = vmatprep.subr.mxu1 %v680_v0  ;;  %631 = vmatprep.subr.mxu0 %v680_v0  ;;  %vm224_vm10 = vmor %vm218_vm8, %vm221_vm9  ;;  %vm411_vm4 = vcmask 60416  }
   0xa   :  { %612 = vmatpush3.msra.mxu1 %v45_v13  ;;  %vm225_vm14 = vmor %vm219_vm12, %vm222_vm13  ;;  %632 = vmatpush3.msra.mxu0 %v416_v6 }
   0xb   :  { %602 = vmatmul.mubr.msk.f32.gmra.mxu0 %vm48_vm1, %v43_v14  ;;  %614 = vmatmul.mubr.msk.f32.vlgmr.msra.gmra.mxu1 %vm48_vm1, %v40_v16 }
   0xc   :  { %604 = vmatprep.mubr.msk.f32.mxu0 %vm681_vm0, %v680_v0  ;;  %616 = vmatprep.subr.mxu1 %v680_v0 }
   0xd   :  { %622 = vmatprep.mubr.msk.f32.mxu1 %vm681_vm0, %v680_v0 }
   0xf   :  { %605 = vmatmul.mubr.msk.f32.gmra.mxu0 %vm48_vm1, %v44_v17  ;;  %vm267_vm1 = vcmask 158720  }
  0x10   :  { %633 = vmatprep.mubr.msk.f32.mxu0 %vm681_vm0, %v680_v0 }
  0xc7   :  { %v124_v18 = vpop.f32.mrf.mxu0 }
  0xc8   :  { %228 = vperm.xlu0 %650, %v124_v18  }
  0xc9   :  { %v600_v19 = vpop.f32.mrf.mxu0 }
  0xcb   :  { %v129_v20 = vpop.f32.mrf.mxu0  ;;  %v207_v21 = vpop.f32.mrf.mxu1 }
  0xcc   :  { %233 = vperm.xlu0 %650, %v129_v20   ;;  %v244_v30 = vrot.slane %v207_v21, %v243_v28 }
  0xcd   :  { %v603_v22 = vpop.f32.mrf.mxu0  ;;  %v615_v23 = vpop.f32.mrf.mxu1 }
  0xcf   :  { %v134_v24 = vpop.f32.mrf.mxu0 }
  0xd0   :  { %238 = vperm.xlu1 %651, %v134_v24   ;;  %617 = vmatpush3.msk.msra.mxu1 %vm308_vm2, %v134_v24  ;;  %vm507_vm2 = vcmask 7168  }
  0xd1   :  { %v606_v25 = vpop.f32.mrf.mxu0  ;;  %618 = vmatprep.subr.mxu1 %v680_v0  ;;  %v508_v8 = vsel %vm507_vm2, %v506_v7, 0.0 }
  0xd2   :  { %619 = vmatpush3.msra.mxu1 %v129_v20 }
  0xd3   :  { %620 = vmatprep.subr.mxu1 %v680_v0 }
  0xd4   :  { %621 = vmatpush3.msra.mxu1 %v124_v18 }
 0x143   :  { %v229_v32 = vpop.permute.xlu0 %228 }
 0x144   :  { %v245_v34 = vadd.f32 %v244_v30, %v229_v32 }
 0x146   :  { %v251_v36 = vmul.f32 0.2, %v245_v34  ;;  %vm248_vm6 = vcmp.gt.f32.partialorder %v245_v34, 0.0 }
 0x147   :  { %v234_v37 = vpop.permute.xlu0 %233 }
 0x148   :  { %v246_v39 = vadd.f32 %v244_v30, %v234_v37  ;;  %v254_v40 = vsel %vm248_vm6, %v245_v34, %v251_v36 }
 0x149   :  { %v257_v42 = vsel %vm223_vm5, %v254_v40, -1e+30 }
 0x14a   :  { %v252_v43 = vmul.f32 0.2, %v246_v39  ;;  %v261_v44 = vsel %vm260_vm7, %v257_v42, -inf  ;;  %vm249_vm11 = vcmp.gt.f32.partialorder %v246_v39, 0.0 }
 0x14b   :  { %262 = vmax.xlane.f32.xlu1 %v261_v44  ;;  %v239_v45 = vpop.permute.xlu1 %238 }
 0x14c   :  { %v247_v46 = vadd.f32 %v244_v30, %v239_v45  ;;  %v255_v47 = vsel %vm249_vm11, %v246_v39, %v252_v43  ;;  %v298_v30 = vrot.slane %v41_v29, %v243_v28  ;;  %v404_v43 = vrot.slane %v41_v29, %v403_v41 }
 0x14d   :  { %v258_v48 = vsel %vm224_vm10, %v255_v47, -1e+30 }
 0x14e   :  { %v253_v49 = vmul.f32 0.2, %v247_v46  ;;  %v264_v50 = vsel %vm260_vm7, %v258_v48, -inf  ;;  %vm250_vm15 = vcmp.gt.f32.partialorder %v247_v46, 0.0 }
 0x14f   :  { %265 = vmax.xlane.f32.xlu0 %v264_v50 }
 0x150   :  { %v256_v51 = vsel %vm250_vm15, %v247_v46, %v253_v49 }
 0x151   :  { %v259_v52 = vsel %vm225_vm14, %v256_v51, -1e+30 }
 0x152   :  { %v268_v53 = vsel %vm267_vm1, %v259_v52, -inf }
 0x153   :  { %269 = vmax.xlane.f32.xlu0 %v268_v53 }
 0x1d4   :  { %v263_v54 = vpop.xlane.xlu1 %262 }
 0x1d5   :  { %v271_v55 = vsub.f32 %v257_v42, %v263_v54  ;;  %v397_v42 = vrot.slane %v41_v29, %v396_v38  ;;  %v683_v54 = vmov 0  }
 0x1d6   :  { %652 = vset.pattern.permute.xlu1 %v683_v54  ;;  %653 = vset.pattern.permute.xlu0 %v683_v54 }
 0x1d7   :  { %v274_v56 = vmul.f32 1.442695, %v271_v55 }
 0x1d8   :  { %v266_v57 = vpop.xlane.xlu0 %265 }
 0x1d9   :  { %654 = vpow2.f32 %v274_v56  ;;  %v272_v58 = vsub.f32 %v258_v48, %v266_v57 }
 0x1db   :  { %v276_v59 = vmul.f32 1.442695, %v272_v58 }
 0x1dc   :  { %v270_v60 = vpop.xlane.xlu0 %269 }
 0x1dd   :  { %656 = vpow2.f32 %v276_v59  ;;  %v273_v61 = vsub.f32 %v259_v52, %v270_v60 }
 0x1df   :  { %v278_v62 = vmul.f32 1.442695, %v273_v61 }
 0x1e1   :  { %658 = vpow2.f32 %v278_v62 }
 0x1e6   :  { %v655_v63 = vpop.eup %654 }
 0x1e7   :  { %v280_v1 = vsel %vm260_vm7, %v655_v63, 0.0 }
 0x1e8   :  { %281 = vadd.xlane.f32.xlu1 %v280_v1 }
 0x1ea   :  { %v657_v2 = vpop.eup %656 }
 0x1eb   :  { %v283_v3 = vsel %vm260_vm7, %v657_v2, 0.0 }
 0x1ec   :  { %284 = vadd.xlane.f32.xlu0 %v283_v3 }
 0x1ee   :  { %v659_v4 = vpop.eup %658 }
 0x1ef   :  { %v286_v5 = vsel %vm267_vm1, %v659_v4, 0.0 }
 0x1f0   :  { %287 = vadd.xlane.f32.xlu1 %v286_v5  ;;  %509 = vadd.xlane.f32.xlu0 %v508_v8 }
 0x271   :  { %v282_v9 = vpop.xlane.xlu1 %281 }
 0x272   :  { %660 = vrcp.f32 %v282_v9 }
 0x275   :  { %v285_v10 = vpop.xlane.xlu0 %284 }
 0x276   :  { %662 = vrcp.f32 %v285_v10 }
 0x279   :  { %v288_v11 = vpop.xlane.xlu1 %287  ;;  %v510_v18 = vpop.xlane.xlu0 %509 }
 0x27a   :  { %664 = vrcp.f32 %v288_v11  ;;  %v511_v19 = vrot.slane %v510_v18, 4 }
 0x27c   :  { %v512_v20 = vadd.f32 %v511_v19, %v510_v18 }
 0x27e   :  { %v513_v21 = vrot.slane %v512_v20, 2 }
 0x27f   :  { %v661_v12 = vpop.eup %660 }
 0x280   :  { %v292_v13 = vmul.f32 %v661_v12, %v655_v63  ;;  %v514_v22 = vadd.f32 %v513_v21, %v512_v20 }
 0x282   :  { %623 = vmatmul.mubr.msk.f32.vlgmr.msra.gmra.mxu1 %vm260_vm7, %v292_v13  ;;  %v515_v23 = vrot.slane %v514_v22, 1 }
 0x283   :  { %v663_v14 = vpop.eup %662  ;;  %625 = vmatprep.mubr.msk.f32.mxu1 %vm681_vm0, %v680_v0 }
 0x284   :  { %v293_v15 = vmul.f32 %v663_v14, %v657_v2  ;;  %v516_v24 = vadd.f32 %v515_v23, %v514_v22 }
 0x286   :  { %626 = vmatmul.mubr.msk.f32.gmra.mxu1 %vm260_vm7, %v293_v15  ;;  %642 = vpush %v516_v24 }
 0x287   :  { %v665_v16 = vpop.eup %664  ;;  %628 = vmatprep.mubr.msk.f32.mxu1 %vm681_vm0, %v680_v0 }
 0x288   :  { %v294_v17 = vmul.f32 %v665_v16, %v659_v4 }
 0x28a   :  { %629 = vmatmul.mubr.msk.f32.gmra.mxu1 %vm260_vm7, %v294_v17 }
 0x2b7   :  { %s643_s6 = spop %642 }
 0x2b8   :  { %v518_v25 = vstv %s643_s6 }
 0x2b9   :  { %666 = vrsqrt.f32 %v518_v25 }
 0x2c6   :  { %v667_v26 = vpop.eup %666 }
 0x2c7   :  { %644 = vpush %v667_v26 }
 0x2f8   :  { %s645_s3 = spop %644 }
 0x2f9   :  { %v521_v55 = vstv %s645_s3 }
 0x342   :  { %v377_v31 = vpop.f32.mrf.mxu1 }
 0x343   :  { %v378_v32 = vadd.f32 %v377_v31, %v298_v30 }
 0x344   :  { %v624_v33 = vpop.f32.mrf.mxu1 }
 0x345   :  { %668 = vtanh.f32 %v378_v32 }
 0x346   :  { %v382_v34 = vpop.f32.mrf.mxu1 }
 0x347   :  { %v383_v35 = vadd.f32 %v382_v34, %v298_v30 }
 0x348   :  { %v627_v36 = vpop.f32.mrf.mxu1 }
 0x349   :  { %670 = vtanh.f32 %v383_v35 }
 0x34a   :  { %v387_v37 = vpop.f32.mrf.mxu1 }
 0x34b   :  { %v388_v39 = vadd.f32 %v387_v37, %v298_v30 }
 0x34c   :  { %v630_v40 = vpop.f32.mrf.mxu1 }
 0x34d   :  { %672 = vtanh.f32 %v388_v39 }
 0x352   :  { %v669_v44 = vpop.eup %668 }
 0x353   :  { %v398_v28 = vmul.f32 %v669_v44, %v397_v42 }
 0x355   :  { %v405_v45 = vadd.f32 %v404_v43, %v398_v28 }
 0x356   :  { %v671_v46 = vpop.eup %670 }
 0x357   :  { %v399_v47 = vmul.f32 %v671_v46, %v397_v42  ;;  %409 = vst.msk [vmem:[%s884_s7] sm:$0xff] %vm408_vm3, %v405_v45 }
 0x359   :  { %v406_v48 = vadd.f32 %v404_v43, %v399_v47 }
 0x35a   :  { %v673_v49 = vpop.eup %672 }
 0x35b   :  { %v400_v50 = vmul.f32 %v673_v49, %v397_v42  ;;  %410 = vst.msk [vmem:[%s884_s7 + $0x8] sm:$0xff] %vm408_vm3, %v406_v48 }
 0x35d   :  { %v407_v27 = vadd.f32 %v404_v43, %v400_v50 }
 0x35e   :  { %v413_v51 = vld [vmem:[%s884_s7] sm:$0xff] }
 0x35f   :  { %412 = vst.msk [vmem:[%s884_s7 + $0x10] sm:$0xf] %vm411_vm4, %v407_v27  ;;  %634 = vmatmul.mubr.msk.f32.vlgmr.msra.gmra.mxu0 %vm408_vm3, %v413_v51 }
 0x360   :  { %636 = vmatprep.mubr.msk.f32.mxu0 %vm681_vm0, %v680_v0 }
 0x362   :  { %v414_v52 = vld [vmem:[%s884_s7 + $0x8] sm:$0xff] }
 0x363   :  { %637 = vmatmul.mubr.msk.f32.gmra.mxu0 %vm408_vm3, %v414_v52 }
 0x364   :  { %639 = vmatprep.mubr.msk.f32.mxu0 %vm681_vm0, %v680_v0  ;;  %vm530_vm0 = vcmask 3072  }
 0x366   :  { %v415_v53 = vld [vmem:[%s884_s7 + $0x10] sm:$0xf] }
 0x367   :  { %640 = vmatmul.mubr.msk.f32.gmra.mxu0 %vm408_vm3, %v415_v53 }
 0x41f   :  { %v492_v56 = vpop.f32.mrf.mxu0 }
 0x420   :  { %v522_v57 = vmul.f32 %v521_v55, %v492_v56 }
 0x421   :  { %v635_v58 = vpop.f32.mrf.mxu0 }
 0x422   :  { %674 = vtanh.f32 %v522_v57 }
 0x423   :  { %v497_v59 = vpop.f32.mrf.mxu0 }
 0x424   :  { %v523_v60 = vmul.f32 %v521_v55, %v497_v59 }
 0x425   :  { %v638_v61 = vpop.f32.mrf.mxu0 }
 0x426   :  { %676 = vtanh.f32 %v523_v60 }
 0x427   :  { %v502_v0 = vpop.f32.mrf.mxu0 }
 0x428   :  { %v524_v62 = vmul.f32 %v521_v55, %v502_v0 }
 0x429   :  { %v641_v63 = vpop.f32.mrf.mxu0 }
 0x42a   :  { %678 = vtanh.f32 %v524_v62 }
 0x42f   :  { %v675_v1 = vpop.eup %674 }
 0x430   :  { %528 = vst.msk [vmem:[%s885_s8] sm:$0xff] %vm507_vm2, %v675_v1  ;;  %534 = vperm.xlu1 %652, %v675_v1  }
 0x433   :  { %v677_v2 = vpop.eup %676 }
 0x434   :  { %529 = vst.msk [vmem:[%s885_s8 + $0x8] sm:$0xff] %vm507_vm2, %v677_v2  ;;  %539 = vperm.xlu0 %653, %v677_v2  }
 0x437   :  { %v679_v3 = vpop.eup %678 }
 0x438   :  { %531 = vst.msk [vmem:[%s885_s8 + $0x10] sm:$0xf] %vm530_vm0, %v679_v3  ;;  %544 = vperm.xlu1 %652, %v679_v3  }
 0x4ab   :  { %v535_v4 = vpop.permute.xlu1 %534 }
 0x4ac   :  { %v547_v5 = vmul.f32 %v535_v4, %v413_v51 }
 0x4ae   :  { %550 = vst.msk [vmem:[%s884_s7] sm:$0xff] %vm408_vm3, %v547_v5 }
 0x4af   :  { %v540_v6 = vpop.permute.xlu0 %539 }
 0x4b0   :  { %v548_v7 = vmul.f32 %v540_v6, %v414_v52 }
 0x4b2   :  { %551 = vst.msk [vmem:[%s884_s7 + $0x8] sm:$0xff] %vm408_vm3, %v548_v7 }
 0x4b3   :  { %v545_v8 = vpop.permute.xlu1 %544 }
 0x4b4   :  { %v549_v9 = vmul.f32 %v545_v8, %v415_v53 }
 0x4b6   :  { %552 = vst.msk [vmem:[%s884_s7 + $0x10] sm:$0xf] %vm411_vm4, %v549_v9 }

// kernel: forward_probs.7
= control target key start
LH: loop header
LB: loop body
LE: loop exit
PB: predicated region body
PF: predicated region fallthrough
CT: control target
= control target key end

     0   :  { %vm16_vm0 = vcmask 59392   ;;  %vm24_vm1 = vcmask 62467   ;;  %v244_v0 = vmov 0.0   ;;  %vm245_vm2 = vmmov 0   ;;  %s289_s1 = inlined_call_operand.vmem [shape: f32[9,8], index: 1, kind: input, shape index: {}]   ;;  %s290_s0 = inlined_call_operand.vmem [shape: f32[12,8], index: 0, kind: input, shape index: {}]   ;;  %s291_s2 = inlined_call_operand.vmem [shape: f32[9,16], index: 2, kind: input, shape index: {}]   ;;  %s292_s3 = inlined_call_operand.vmem [shape: f32[4,16], index: 3, kind: output, shape index: {}]  }
   0x1   :  { %232 = vmatprep.subr.mxu0 %v244_v0  ;;  %v58_v1 = vld [vmem:[%s289_s1] sm:$0xff]  ;;  %234 = vmatprep.mubr.msk.f32.mxu0 %vm245_vm2, %v244_v0  ;;  %v15_v3 = vld [vmem:[%s290_s0 + $0x8] sm:$0xf]  ;;  %vm32_vm3 = vcmask 64518   ;;  %vm34_vm4 = vcmask 57344   ;;  %vm43_vm5 = vcmask 60417  }
   0x2   :  { %v14_v2 = vld [vmem:[%s290_s0] sm:$0xff]  ;;  %233 = vmatpush3.msra.mxu0 %v58_v1  ;;  %v35_v7 = vsel %vm34_vm4, %v15_v3, -inf  ;;  %237 = vmatprep.subr.mxu1 %v244_v0  ;;  %v44_v11 = vsel %vm43_vm5, %v15_v3, -inf  ;;  %vm51_vm6 = vcmask 1040384   ;;  %vm53_vm7 = vcmask 1041408  }
   0x3   :  { %v17_v4 = vsel %vm16_vm0, %v14_v2, -inf  ;;  %v25_v5 = vsel %vm24_vm1, %v14_v2, -inf  ;;  %v33_v6 = vsel %vm32_vm3, %v14_v2, -inf  ;;  %239 = vmatprep.mubr.msk.f32.mxu1 %vm245_vm2, %v244_v0  ;;  %v45_v15 = vrot.slane %v44_v11, 4  ;;  %v60_v38 = vld [vmem:[%s291_s2] sm:$0xff] }
   0x4   :  { %v18_v8 = vrot.slane %v17_v4, 4  ;;  %v26_v9 = vrot.slane %v25_v5, 4  ;;  %v36_v10 = vmax.f32 %v33_v6, %v35_v7  ;;  %vm55_vm8 = vcmask 1042432   ;;  %238 = vmatpush3.msra.mxu1 %v60_v38  ;;  %v224_v39 = vld [vmem:[%s289_s1 + $0x8] ss:$0 sm:$0xff] }
   0x5   :  { %v46_v19 = vmax.f32 %v44_v11, %v45_v15  ;;  %vm66_vm9 = vcmask 64512   ;;  %v226_v44 = vld [vmem:[%s291_s2 + $0x8] ss:$0 sm:$0xff]  ;;  %vm218_vm10 = vcmask 125952  }
   0x6   :  { %v19_v12 = vmax.f32 %v17_v4, %v18_v8  ;;  %v27_v13 = vmax.f32 %v25_v5, %v26_v9  ;;  %v37_v14 = vrot.slane %v36_v10, 4 }
   0x7   :  { %v47_v23 = vrot.slane %v46_v19, 2 }
   0x8   :  { %v20_v16 = vrot.slane %v19_v12, 2  ;;  %v28_v17 = vrot.slane %v27_v13, 2  ;;  %v38_v18 = vmax.f32 %v36_v10, %v37_v14 }
   0x9   :  { %v48_v27 = vmax.f32 %v46_v19, %v47_v23 }
   0xa   :  { %v21_v20 = vmax.f32 %v19_v12, %v20_v16  ;;  %v29_v21 = vmax.f32 %v27_v13, %v28_v17  ;;  %v39_v22 = vrot.slane %v38_v18, 2 }
   0xb   :  { %v49_v31 = vrot.slane %v48_v27, 1 }
   0xc   :  { %v22_v24 = vrot.slane %v21_v20, 1  ;;  %v30_v25 = vrot.slane %v29_v21, 1  ;;  %v40_v26 = vmax.f32 %v38_v18, %v39_v22 }
   0xd   :  { %v50_v33 = vmax.f32 %v48_v27, %v49_v31 }
   0xe   :  { %v23_v28 = vmax.f32 %v21_v20, %v22_v24  ;;  %v31_v29 = vmax.f32 %v29_v21, %v30_v25  ;;  %v41_v30 = vrot.slane %v40_v26, 1 }
  0x10   :  { %v42_v32 = vmax.f32 %v40_v26, %v41_v30  ;;  %v52_v34 = vsel %vm51_vm6, %v23_v28, %v31_v29 }
  0x12   :  { %v54_v35 = vsel %vm53_vm7, %v52_v34, %v42_v32 }
  0x13   :  { %v56_v36 = vsel %vm55_vm8, %v54_v35, %v50_v33 }
  0x14   :  { %v57_v37 = vmax.f32 %v56_v36, 0.0 }
  0x16   :  { %235 = vmatmul.mubr.msk.f32.vlgmr.msra.gmra.mxu0 %vm66_vm9, %v57_v37 }
  0xd6   :  { %v136_v40 = vpop.f32.mrf.mxu0 }
  0xd7   :  { %v137_v41 = vadd.f32 %v224_v39, %v136_v40 }
  0xd8   :  { %v236_v42 = vpop.f32.mrf.mxu0 }
  0xd9   :  { %v140_v43 = vmax.f32 %v137_v41, 0.0 }
  0xdb   :  { %240 = vmatmul.mubr.msk.f32.vlgmr.msra.gmra.mxu1 %vm66_vm9, %v140_v43 }
 0x19b   :  { %v214_v45 = vpop.f32.mrf.mxu1 }
 0x19c   :  { %v215_v46 = vadd.f32 %v226_v44, %v214_v45 }
 0x19d   :  { %v241_v47 = vpop.f32.mrf.mxu1 }
 0x19e   :  { %219 = vst.msk [vmem:[%s292_s3] sm:$0xf] %vm218_vm10, %v215_v46 }

// kernel: forward_probs.8
= control target key start
LH: loop header
LB: loop body
LE: loop exit
PB: predicated region body
PF: predicated region fallthrough
CT: control target
= control target key end

     0   :  { %v630_v0 = vmov 0.0   ;;  %vm631_vm0 = vmmov 0   ;;  %vm31_vm1 = vcmask 130048   ;;  %v632_v7 = vmov 26   ;;  %s637_s11 = smov 16   ;;  %s638_s12 = smov 8   ;;  %s765_s3 = inlined_call_operand.vmem [shape: f32[16,27], index: 3, kind: input, shape index: {}]   ;;  %s766_s0 = inlined_call_operand.vmem [shape: f32[4,16], index: 0, kind: input, shape index: {}]   ;;  %s767_s1 = inlined_call_operand.vmem [shape: f32[16,4], index: 1, kind: input, shape index: {}]   ;;  %s768_s4 = inlined_call_operand.vmem [shape: f32[3,16], index: 4, kind: input, shape index: {}]   ;;  %s769_s2 = inlined_call_operand.vmem [shape: f32[4,4], index: 2, kind: input, shape index: {}]   ;;  %s770_s5 = inlined_call_operand.vmem [shape: f32[3,24], index: 5, kind: input, shape index: {}]   ;;  %s771_s6 = inlined_call_operand.vmem [shape: f32[4,24], index: 6, kind: output, shape index: {}]  }
   0x1   :  { %570 = vmatprep.subr.mxu0 %v630_v0  ;;  %v28_v1 = vld [vmem:[%s765_s3 + $0x8] sm:$0xff]  ;;  %v27_v2 = vld [vmem:[%s765_s3] sm:$0xff]  ;;  %574 = vmatprep.mubr.msk.f32.mxu0 %vm631_vm0, %v630_v0  ;;  %v633_v8 = vmov 24   ;;  %vm219_vm2 = vcmask 1043456   ;;  %v634_v13 = vmov 25   ;;  %v178_v14 = vlaneseq }
   0x2   :  { %571 = vmatpush3.msra.mxu0 %v28_v1  ;;  %v23_v3 = vld [vmem:[%s766_s0] sm:$0xf]  ;;  %577 = vmatprep.subr.mxu1 %v630_v0  ;;  %v25_v4 = vld [vmem:[%s767_s1 + $0x8] sm:$0xff]  ;;  %vm199_vm8 = vcmask 27648   ;;  %vm215_vm10 = vcmask 31744   ;;  %vm303_vm11 = vcmask 60416  }
   0x3   :  { %v24_v5 = vld [vmem:[%s767_s1] sm:$0xff]  ;;  %572 = vmatprep.subr.mxu0 %v630_v0  ;;  %578 = vmatpush3.msra.mxu1 %v25_v4  ;;  %v714_v15 = vshrl.u32 %v178_v14, 7  ;;  %v181_v18 = vand.u32 127, %v178_v14  ;;  %vm425_vm12 = vcmask 126016   ;;  %vm544_vm13 = vcmask 191616  }
   0x4   :  { %573 = vmatpush3.msra.mxu0 %v27_v2  ;;  %579 = vmatprep.subr.mxu1 %v630_v0  ;;  %v29_v6 = vld [vmem:[%s768_s4] sm:$0x7]  ;;  %s636_s4 = smov 112  }
   0x5   :  { %575 = vmatmul.mubr.msk.f32.vlgmr.msra.gmra.mxu0 %vm31_vm1, %v23_v3  ;;  %580 = vmatpush3.msra.mxu1 %v24_v5  ;;  %v300_v16 = vsub.s32 2, %v714_v15  ;;  %v192_v17 = vsub.s32 0, %v714_v15  ;;  %v26_v21 = vld [vmem:[%s769_s2] sm:$0xf]  ;;  %v295_v24 = vsub.s32 1, %v714_v15  ;;  %vm183_vm4 = vcmp.eq.s32.totalorder %v714_v15, %v181_v18  ;;  %s635_s2 = smov 120  }
   0x6   :  { %581 = vmatprep.mubr.msk.f32.mxu1 %vm631_vm0, %v630_v0  ;;  %610 = vset.pattern.permute.xlu1 %v632_v7  ;;  %vm182_vm3 = vcmp.gt.f32.partialorder %v26_v21, 0.0  ;;  %v30_v58 = vld [vmem:[%s770_s5] sm:$0x7] }
   0x7   :  { %582 = vmatmul.mubr.msk.f32.vlgmr.msra.gmra.mxu1 %vm31_vm1, %v29_v6  ;;  %608 = vset.pattern.permute.xlu0 %v633_v8  ;;  %vm727_vm5 = vmor %vm182_vm3, %vm183_vm4  ;;  %v214_v59 = vrot.slane %v30_v58, %v192_v17  ;;  %v296_v60 = vrot.slane %v30_v58, %v295_v24  ;;  %v301_v61 = vrot.slane %v30_v58, %v300_v16 }
   0x8   :  { %584 = vmatprep.subr.mxu0 %v630_v0  ;;  %589 = vmatprep.subr.mxu1 %v630_v0 }
   0x9   :  { %586 = vmatprep.mubr.msk.f32.mxu0 %vm631_vm0, %v630_v0  ;;  %591 = vmatprep.mubr.msk.f32.mxu1 %vm631_vm0, %v630_v0 }
  0xc5   :  { %v706_v9 = vpop.f32.mrf.mxu0 }
  0xc6   :  { %428 = vperm.xlu1 %610, %v706_v9   ;;  %187 = vperm.xlu0 %608, %v706_v9  }
  0xc7   :  { %585 = vmatpush3.msk.msra.mxu0 %vm219_vm2, %v706_v9  ;;  %v576_v10 = vpop.f32.mrf.mxu0  ;;  %v174_v11 = vpop.f32.mrf.mxu1 }
  0xc8   :  { %594 = vmatprep.subr.mxu0 %v630_v0  ;;  %v434_v19 = vrot.slane %v174_v11, %v300_v16  ;;  %v193_v20 = vrot.slane %v174_v11, %v192_v17  ;;  %v312_v30 = vrot.slane %v174_v11, %v295_v24 }
  0xc9   :  { %v583_v12 = vpop.f32.mrf.mxu1 }
  0xca   :  { %609 = vset.pattern.permute.xlu0 %v634_v13 }
  0xcb   :  { %306 = vperm.xlu0 %609, %v706_v9  }
  0xcf   :  { %611 = vset.pattern.permute.xlu0 %v632_v7 }
 0x141   :  { %v429_v22 = vpop.permute.xlu1 %428  ;;  %v188_v23 = vpop.permute.xlu0 %187 }
 0x142   :  { %v435_v25 = vadd.f32 %v434_v19, %v429_v22  ;;  %v194_v26 = vadd.f32 %v193_v20, %v188_v23 }
 0x144   :  { %v437_v27 = vmul.f32 0.2, %v435_v25  ;;  %v196_v28 = vmul.f32 0.2, %v194_v26  ;;  %vm195_vm6 = vcmp.gt.f32.partialorder %v194_v26, 0.0  ;;  %vm436_vm7 = vcmp.gt.f32.partialorder %v435_v25, 0.0 }
 0x146   :  { %v307_v31 = vpop.permute.xlu0 %306  ;;  %v197_v32 = vsel %vm195_vm6, %v194_v26, %v196_v28  ;;  %v438_v33 = vsel %vm436_vm7, %v435_v25, %v437_v27 }
 0x147   :  { %v313_v34 = vadd.f32 %v312_v30, %v307_v31  ;;  %v198_v35 = vsel %vm727_vm5, %v197_v32, -1e+30  ;;  %v439_v38 = vsel %vm727_vm5, %v438_v33, -1e+30 }
 0x148   :  { %v200_v36 = vsel %vm199_vm8, %v198_v35, -inf  ;;  %v440_v40 = vsel %vm199_vm8, %v439_v38, -inf }
 0x149   :  { %v315_v37 = vmul.f32 0.2, %v313_v34  ;;  %201 = vmax.xlane.f32.xlu1 %v200_v36  ;;  %vm314_vm9 = vcmp.gt.f32.partialorder %v313_v34, 0.0 }
 0x14b   :  { %v316_v39 = vsel %vm314_vm9, %v313_v34, %v315_v37 }
 0x14c   :  { %v317_v41 = vsel %vm727_vm5, %v316_v39, -1e+30 }
 0x14d   :  { %441 = vmax.xlane.f32.xlu1 %v440_v40  ;;  %v318_v42 = vsel %vm199_vm8, %v317_v41, -inf }
 0x14e   :  { %319 = vmax.xlane.f32.xlu0 %v318_v42 }
 0x1d2   :  { %v202_v43 = vpop.xlane.xlu1 %201 }
 0x1d3   :  { %v203_v44 = vsub.f32 %v198_v35, %v202_v43 }
 0x1d5   :  { %v204_v45 = vmul.f32 1.442695, %v203_v44 }
 0x1d6   :  { %v442_v46 = vpop.xlane.xlu1 %441 }
 0x1d7   :  { %612 = vpow2.f32 %v204_v45  ;;  %v443_v47 = vsub.f32 %v439_v38, %v442_v46  ;;  %v320_v48 = vpop.xlane.xlu0 %319 }
 0x1d8   :  { %v321_v49 = vsub.f32 %v317_v41, %v320_v48 }
 0x1d9   :  { %v444_v50 = vmul.f32 1.442695, %v443_v47 }
 0x1da   :  { %v322_v51 = vmul.f32 1.442695, %v321_v49 }
 0x1db   :  { %614 = vpow2.f32 %v444_v50 }
 0x1dc   :  { %616 = vpow2.f32 %v322_v51 }
 0x1e4   :  { %v613_v52 = vpop.eup %612 }
 0x1e5   :  { %v206_v53 = vsel %vm199_vm8, %v613_v52, 0.0 }
 0x1e6   :  { %207 = vadd.xlane.f32.xlu0 %v206_v53 }
 0x1e8   :  { %v615_v54 = vpop.eup %614 }
 0x1e9   :  { %v617_v55 = vpop.eup %616  ;;  %v446_v56 = vsel %vm199_vm8, %v615_v54, 0.0 }
 0x1ea   :  { %447 = vadd.xlane.f32.xlu0 %v446_v56  ;;  %v324_v57 = vsel %vm199_vm8, %v617_v55, 0.0 }
 0x1eb   :  { %325 = vadd.xlane.f32.xlu1 %v324_v57 }
 0x1fc   :  { %329 = vrot.lane.b32.xlu1 %v706_v9, %s635_s2 }
 0x200   :  { %451 = vrot.lane.b32.xlu0 %v706_v9, %s636_s4  ;;  %332 = vrot.lane.b32.xlu1 %v214_v59, %s635_s2 }
 0x204   :  { %412 = vrot.lane.b32.xlu0 %v296_v60, %s635_s2  ;;  %453 = vrot.lane.b32.xlu1 %v214_v59, %s636_s4 }
 0x208   :  { %417 = vrot.lane.b32.xlu0 %v301_v61, %s635_s2  ;;  %532 = vrot.lane.b32.xlu1 %v296_v60, %s636_s4 }
 0x20c   :  { %536 = vrot.lane.b32.xlu1 %v301_v61, %s636_s4 }
 0x26f   :  { %v208_v62 = vpop.xlane.xlu0 %207 }
 0x270   :  { %618 = vrcp.f32 %v208_v62 }
 0x273   :  { %v448_v63 = vpop.xlane.xlu0 %447 }
 0x274   :  { %620 = vrcp.f32 %v448_v63  ;;  %v326_v1 = vpop.xlane.xlu1 %325 }
 0x275   :  { %622 = vrcp.f32 %v326_v1 }
 0x277   :  { %v452_v5 = vpop.permute.xlu0 %451 }
 0x278   :  { %v330_v2 = vpop.permute.xlu1 %329 }
 0x279   :  { %590 = vmatpush3.msk.msra.mxu1 %vm219_vm2, %v330_v2 }
 0x27b   :  { %v413_v21 = vpop.permute.xlu0 %412 }
 0x27c   :  { %v333_v10 = vpop.permute.xlu1 %332 }
 0x27d   :  { %v619_v3 = vpop.eup %618 }
 0x27e   :  { %v210_v4 = vmul.f32 %v619_v3, %v613_v52 }
 0x27f   :  { %v418_v29 = vpop.permute.xlu0 %417 }
 0x280   :  { %587 = vmatmul.mubr.msk.f32.vlgmr.msra.gmra.mxu0 %vm215_vm10, %v210_v4  ;;  %v454_v14 = vpop.permute.xlu1 %453 }
 0x281   :  { %v621_v6 = vpop.eup %620  ;;  %595 = vmatpush3.msk.msra.mxu0 %vm219_vm2, %v452_v5  ;;  %596 = vmatprep.mubr.msk.f32.mxu0 %vm631_vm0, %v630_v0 }
 0x282   :  { %v623_v7 = vpop.eup %622  ;;  %v450_v8 = vmul.f32 %v621_v6, %v615_v54 }
 0x283   :  { %v328_v9 = vmul.f32 %v623_v7, %v617_v55 }
 0x284   :  { %597 = vmatmul.mubr.msk.f32.vlgmr.msra.gmra.mxu0 %vm215_vm10, %v450_v8  ;;  %v533_v0 = vpop.permute.xlu1 %532 }
 0x285   :  { %592 = vmatmul.mubr.msk.f32.vlgmr.msra.gmra.mxu1 %vm215_vm10, %v328_v9 }
 0x288   :  { %v537_v26 = vpop.permute.xlu1 %536 }
 0x340   :  { %v288_v11 = vpop.f32.mrf.mxu0 }
 0x341   :  { %v289_v12 = vadd.f32 %v288_v11, %v214_v59 }
 0x342   :  { %v588_v13 = vpop.f32.mrf.mxu0 }
 0x343   :  { %624 = vtanh.f32 %v289_v12 }
 0x344   :  { %v527_v15 = vpop.f32.mrf.mxu0 }
 0x345   :  { %v528_v16 = vadd.f32 %v527_v15, %v454_v14  ;;  %v406_v17 = vpop.f32.mrf.mxu1 }
 0x346   :  { %v407_v18 = vadd.f32 %v406_v17, %v333_v10  ;;  %v598_v19 = vpop.f32.mrf.mxu0 }
 0x347   :  { %626 = vtanh.f32 %v528_v16  ;;  %v593_v20 = vpop.f32.mrf.mxu1 }
 0x348   :  { %628 = vtanh.f32 %v407_v18 }
 0x350   :  { %v625_v22 = vpop.eup %624 }
 0x351   :  { %v297_v23 = vmul.f32 %v625_v22, %v296_v60 }
 0x353   :  { %v302_v24 = vadd.f32 %v301_v61, %v297_v23 }
 0x354   :  { %v627_v25 = vpop.eup %626 }
 0x355   :  { %v629_v27 = vpop.eup %628  ;;  %v535_v28 = vmul.f32 %v627_v25, %v533_v0  ;;  %304 = vst.msk [vmem:[%s771_s6] sm:$0xf] %vm303_vm11, %v302_v24 }
 0x356   :  { %v415_v30 = vmul.f32 %v629_v27, %v413_v21 }
 0x357   :  { %v539_v31 = vadd.f32 %v537_v26, %v535_v28 }
 0x358   :  { %v420_v32 = vadd.f32 %v418_v29, %v415_v30 }
 0x359   :  { %541 = vrot.lane.b32.xlu1 %v539_v31, %s637_s11 }
 0x35a   :  { %422 = vrot.lane.b32.xlu0 %v420_v32, %s638_s12 }
 0x3cb   :  { %v542_v34 = vpop.permute.xlu1 %541 }
 0x3cc   :  { %v423_v33 = vpop.permute.xlu0 %422 }
 0x3cd   :  { %426 = vst.msk [vmem:[%s771_s6] sm:$0xf] %vm425_vm12, %v423_v33 }
 0x3ce   :  { %545 = vst.msk [vmem:[%s771_s6] sm:$0xf] %vm544_vm13, %v542_v34 }

// kernel: forward_probs.9
= control target key start
LH: loop header
LB: loop body
LE: loop exit
PB: predicated region body
PF: predicated region fallthrough
CT: control target
= control target key end

     0   :  { %v555_v0 = vmov 0.0   ;;  %vm556_vm0 = vmmov 0   ;;  %vm39_vm1 = vcmask 195584   ;;  %v557_v9 = vmov 8   ;;  %s667_s3 = inlined_call_operand.vmem [shape: f32[24,9], index: 3, kind: input, shape index: {}]   ;;  %s668_s1 = inlined_call_operand.vmem [shape: f32[24,4], index: 1, kind: input, shape index: {}]   ;;  %s669_s0 = inlined_call_operand.vmem [shape: f32[4,24], index: 0, kind: input, shape index: {}]   ;;  %s670_s4 = inlined_call_operand.vmem [shape: f32[1,24], index: 4, kind: input, shape index: {}]   ;;  %s671_s2 = inlined_call_operand.vmem [shape: f32[4,4], index: 2, kind: input, shape index: {}]   ;;  %s672_s6 = inlined_call_operand.vmem [shape: f32[9,8], index: 6, kind: input, shape index: {}]   ;;  %s673_s5 = inlined_call_operand.vmem [shape: f32[3,8], index: 5, kind: input, shape index: {}]   ;;  %s674_s7 = inlined_call_operand.vmem [shape: f32[9,1], index: 7, kind: input, shape index: {}]   ;;  %s675_s8 = inlined_call_operand.vmem [shape: f32[4,1], index: 8, kind: output, shape index: {}]  }
   0x1   :  { %508 = vmatprep.subr.mxu0 %v555_v0  ;;  %v36_v1 = vld [vmem:[%s667_s3 + $0x10] sm:$0xff]  ;;  %v35_v2 = vld [vmem:[%s667_s3 + $0x8] sm:$0xff]  ;;  %514 = vmatprep.mubr.msk.f32.mxu0 %vm556_vm0, %v555_v0  ;;  %v34_v5 = vld [vmem:[%s667_s3] sm:$0xff]  ;;  %vm227_vm2 = vcmask 1043456   ;;  %v186_v14 = vlaneseq  ;;  %vm207_vm7 = vcmask 27648   ;;  %vm223_vm8 = vcmask 31744  }
   0x2   :  { %509 = vmatpush3.msra.mxu0 %v36_v1  ;;  %517 = vmatprep.subr.mxu1 %v555_v0  ;;  %v32_v3 = vld [vmem:[%s668_s1 + $0x10] sm:$0xff]  ;;  %v31_v4 = vld [vmem:[%s668_s1 + $0x8] sm:$0xff]  ;;  %v29_v6 = vld [vmem:[%s669_s0] sm:$0xf]  ;;  %vm311_vm9 = vcmask 60416   ;;  %vm322_vm10 = vcmask 64512  }
   0x3   :  { %510 = vmatprep.subr.mxu0 %v555_v0  ;;  %518 = vmatpush3.msra.mxu1 %v32_v3  ;;  %v30_v7 = vld [vmem:[%s668_s1] sm:$0xff]  ;;  %v187_v15 = vshrl.u32 %v186_v14, 7  ;;  %v189_v17 = vand.u32 127, %v186_v14  ;;  %v490_v49 = vld [vmem:[%s672_s6 + $0x8] ss:$0 sm:$0xff]  ;;  %vm480_vm11 = vcmask 3072  }
   0x4   :  { %511 = vmatpush3.msra.mxu0 %v35_v2  ;;  %519 = vmatprep.subr.mxu1 %v555_v0  ;;  %v37_v8 = vld [vmem:[%s670_s4] sm:$0x1]  ;;  %v492_v54 = vld [vmem:[%s674_s7 + $0x8] ss:$0 sm:$0xff] }
   0x5   :  { %512 = vmatprep.subr.mxu0 %v555_v0  ;;  %520 = vmatpush3.msra.mxu1 %v31_v4  ;;  %v200_v16 = vsub.s32 0, %v187_v15  ;;  %v33_v19 = vld [vmem:[%s671_s2] sm:$0xf]  ;;  %vm191_vm4 = vcmp.eq.s32.totalorder %v187_v15, %v189_v17  ;;  %v303_v40 = vsub.s32 1, %v187_v15  ;;  %v308_v41 = vsub.s32 2, %v187_v15 }
   0x6   :  { %513 = vmatpush3.msra.mxu0 %v34_v5  ;;  %521 = vmatprep.subr.mxu1 %v555_v0  ;;  %vm190_vm3 = vcmp.gt.f32.partialorder %v33_v19, 0.0  ;;  %v314_v34 = vld [vmem:[%s672_s6] sm:$0xff] }
   0x7   :  { %515 = vmatmul.mubr.msk.f32.vlgmr.msra.gmra.mxu0 %vm39_vm1, %v29_v6  ;;  %522 = vmatpush3.msra.mxu1 %v30_v7  ;;  %vm192_vm5 = vmor %vm190_vm3, %vm191_vm4  ;;  %v38_v35 = vld [vmem:[%s673_s5] sm:$0x7] }
   0x8   :  { %523 = vmatprep.mubr.msk.f32.mxu1 %vm556_vm0, %v555_v0  ;;  %544 = vset.pattern.permute.xlu0 %v557_v9  ;;  %v222_v36 = vrot.slane %v38_v35, %v200_v16  ;;  %v304_v42 = vrot.slane %v38_v35, %v303_v40  ;;  %v309_v43 = vrot.slane %v38_v35, %v308_v41  ;;  %v316_v48 = vld [vmem:[%s674_s7] sm:$0xff] }
   0x9   :  { %524 = vmatmul.mubr.msk.f32.vlgmr.msra.gmra.mxu1 %vm39_vm1, %v37_v8  ;;  %526 = vmatprep.subr.mxu0 %v555_v0 }
   0xa   :  { %528 = vmatprep.mubr.msk.f32.mxu0 %vm556_vm0, %v555_v0  ;;  %531 = vmatprep.subr.mxu1 %v555_v0 }
   0xb   :  { %533 = vmatprep.mubr.msk.f32.mxu1 %vm556_vm0, %v555_v0  ;;  %532 = vmatpush3.msra.mxu1 %v314_v34 }
  0xc7   :  { %v109_v10 = vpop.f32.mrf.mxu0 }
  0xc8   :  { %195 = vperm.xlu0 %544, %v109_v10   ;;  %527 = vmatpush3.msk.msra.mxu0 %vm227_vm2, %v109_v10 }
  0xc9   :  { %v516_v11 = vpop.f32.mrf.mxu0  ;;  %v182_v12 = vpop.f32.mrf.mxu1  ;;  %536 = vmatprep.subr.mxu0 %v555_v0 }
  0xca   :  { %v201_v18 = vrot.slane %v182_v12, %v200_v16 }
  0xcb   :  { %v525_v13 = vpop.f32.mrf.mxu1 }
 0x143   :  { %v196_v20 = vpop.permute.xlu0 %195 }
 0x144   :  { %v202_v21 = vadd.f32 %v201_v18, %v196_v20 }
 0x146   :  { %v204_v22 = vmul.f32 0.2, %v202_v21  ;;  %vm203_vm6 = vcmp.gt.f32.partialorder %v202_v21, 0.0 }
 0x148   :  { %v205_v23 = vsel %vm203_vm6, %v202_v21, %v204_v22 }
 0x149   :  { %v206_v24 = vsel %vm192_vm5, %v205_v23, -1e+30 }
 0x14a   :  { %v208_v25 = vsel %vm207_vm7, %v206_v24, -inf }
 0x14b   :  { %209 = vmax.xlane.f32.xlu0 %v208_v25 }
 0x1d4   :  { %v210_v26 = vpop.xlane.xlu0 %209 }
 0x1d5   :  { %v211_v27 = vsub.f32 %v206_v24, %v210_v26 }
 0x1d7   :  { %v212_v28 = vmul.f32 1.442695, %v211_v27 }
 0x1d9   :  { %545 = vpow2.f32 %v212_v28 }
 0x1e6   :  { %v546_v29 = vpop.eup %545 }
 0x1e7   :  { %v214_v30 = vsel %vm207_vm7, %v546_v29, 0.0 }
 0x1e8   :  { %215 = vadd.xlane.f32.xlu1 %v214_v30 }
 0x271   :  { %v216_v31 = vpop.xlane.xlu1 %215 }
 0x272   :  { %547 = vrcp.f32 %v216_v31 }
 0x27f   :  { %v548_v32 = vpop.eup %547 }
 0x280   :  { %v218_v33 = vmul.f32 %v548_v32, %v546_v29 }
 0x282   :  { %529 = vmatmul.mubr.msk.f32.vlgmr.msra.gmra.mxu0 %vm223_vm8, %v218_v33 }
 0x283   :  { %538 = vmatprep.mubr.msk.f32.mxu0 %vm556_vm0, %v555_v0  ;;  %537 = vmatpush3.msra.mxu0 %v316_v48 }
 0x342   :  { %v296_v37 = vpop.f32.mrf.mxu0 }
 0x343   :  { %v297_v38 = vadd.f32 %v296_v37, %v222_v36 }
 0x344   :  { %v530_v39 = vpop.f32.mrf.mxu0 }
 0x345   :  { %549 = vtanh.f32 %v297_v38 }
 0x352   :  { %v550_v44 = vpop.eup %549 }
 0x353   :  { %v305_v45 = vmul.f32 %v550_v44, %v304_v42 }
 0x355   :  { %v310_v46 = vadd.f32 %v309_v43, %v305_v45 }
 0x357   :  { %312 = vst.msk [vmem:[#allocation2] sm:$0xf] %vm311_vm9, %v310_v46 }
 0x35e   :  { %v313_v47 = vld [vmem:[#allocation2] sm:$0xf] }
 0x35f   :  { %534 = vmatmul.mubr.msk.f32.vlgmr.msra.gmra.mxu1 %vm322_vm10, %v313_v47 }
 0x41f   :  { %v392_v50 = vpop.f32.mrf.mxu1 }
 0x420   :  { %v393_v51 = vadd.f32 %v490_v49, %v392_v50 }
 0x421   :  { %v535_v52 = vpop.f32.mrf.mxu1 }
 0x422   :  { %v396_v53 = vmax.f32 %v393_v51, 0.0 }
 0x424   :  { %539 = vmatmul.mubr.msk.f32.vlgmr.msra.gmra.mxu0 %vm322_vm10, %v396_v53 }
 0x4e4   :  { %v470_v55 = vpop.f32.mrf.mxu0 }
 0x4e5   :  { %v471_v56 = vadd.f32 %v492_v54, %v470_v55 }
 0x4e6   :  { %v540_v57 = vpop.f32.mrf.mxu0 }
 0x4e7   :  { %v474_v58 = vsub.f32 0.0, %v471_v56 }
 0x4e9   :  { %v475_v59 = vmul.f32 1.442695, %v474_v58 }
 0x4eb   :  { %551 = vpow2.f32 %v475_v59 }
 0x4f8   :  { %v552_v60 = vpop.eup %551 }
 0x4f9   :  { %v477_v61 = vadd.f32 1.0, %v552_v60 }
 0x4fb   :  { %553 = vrcp.f32 %v477_v61 }
 0x508   :  { %v554_v62 = vpop.eup %553 }
 0x509   :  { %481 = vst.msk [vmem:[%s675_s8] sm:$0xf] %vm480_vm11, %v554_v62 }

</bundles_post_ra>
